<compile_context>
chip_gen: v7x
topology: tpu7x:2x2x1
jax: 0.10.0
libtpu: 0.0.40
codegen_flags: <defaults>
</compile_context>

<pallas_src>
import math
from functools import partial

import jax
import jax.numpy as jnp
from jax import lax
from jax.experimental import pallas as pl
from jax.experimental.pallas import tpu as pltpu

# ----------------------------- small BERT config -----------------------------
CFG = dict(
    vocab=100,
    hidden=32,
    heads=2,
    intermediate=64,
    layers=2,
    max_pos=16,
    type_vocab=2,
    num_labels=6,
    eps=1e-12,
)


# ------------------------------ in-kernel helpers ------------------------------
def _layernorm(x, g, b, eps):
    mu = jnp.mean(x, axis=-1, keepdims=True)
    xc = x - mu
    var = jnp.mean(xc * xc, axis=-1, keepdims=True)
    return xc * lax.rsqrt(var + eps) * g + b


def _gelu(x):
    # TODO(synk): HF BERT uses erf-GELU; tanh approximation differs negligibly.
    return 0.5 * x * (1.0 + jnp.tanh(0.7978845608028654 * (x + 0.044715 * x * x * x)))


# ------------------------------ fused encoder kernel ---------------------------
def _encoder_kernel(mask_ref, x_ref, embg_ref, embb_ref,
                    wqkv_ref, bqkv_ref, wo_ref, bo_ref, g1_ref, b1_ref,
                    wi_ref, bi_ref, wo2_ref, bo2_ref, g2_ref, b2_ref,
                    clsw_ref, clsb_ref,
                    out_ref, x_scr,
                    *, n_pair, seq, hidden, heads, eps):
    l = pl.program_id(0)
    dh = hidden // heads
    scale = 1.0 / math.sqrt(dh)
    bc = 2 * n_pair  # combined batch (both inputs of the double-input model)

    # ---- layer 0: embedding LayerNorm into the persistent activation scratch ----
    @pl.when(l == 0)
    def _():
        x_scr[...] = _layernorm(x_ref[...].astype(jnp.float32),
                                embg_ref[...], embb_ref[...], eps)

    x = x_scr[...]                                            # (BS, H), f32

    # ---- self-attention (fused QKV matmul, all batches/heads in one pass) ----
    qkv = jnp.dot(x, wqkv_ref[...],
                  preferred_element_type=jnp.float32) + bqkv_ref[...]   # (BS, 3H)
    mask = mask_ref[...]                                      # (BS, BS) additive

    ctx_heads = []
    for h in range(heads):                                    # static unroll (heads=2)
        qh = qkv[:, h * dh:(h + 1) * dh]
        kh = qkv[:, hidden + h * dh:hidden + (h + 1) * dh]
        vh = qkv[:, 2 * hidden + h * dh:2 * hidden + (h + 1) * dh]
        s = lax.dot_general(qh, kh, (((1,), (1,)), ((), ())),
                            preferred_element_type=jnp.float32) * scale
        s = s + mask                                          # block-diag + key padding
        s = s - jnp.max(s, axis=-1, keepdims=True)
        p = jnp.exp(s)
        p = p * pl.reciprocal(jnp.sum(p, axis=-1, keepdims=True), approx=True)
        ctx_heads.append(jnp.dot(p, vh, preferred_element_type=jnp.float32))
    ctx = jnp.concatenate(ctx_heads, axis=1)                  # (BS, H)

    attn_out = jnp.dot(ctx, wo_ref[...],
                       preferred_element_type=jnp.float32) + bo_ref[...]
    x = _layernorm(attn_out + x, g1_ref[...], b1_ref[...], eps)

    # ---- feed-forward ----
    hmid = _gelu(jnp.dot(x, wi_ref[...],
                         preferred_element_type=jnp.float32) + bi_ref[...])
    ff = jnp.dot(hmid, wo2_ref[...],
                 preferred_element_type=jnp.float32) + bo2_ref[...]
    x = _layernorm(ff + x, g2_ref[...], b2_ref[...], eps)

    x_scr[...] = x                                            # carry to next layer

    # ---- last layer: CLS pooling, CLS concat and classifier, single store ----
    @pl.when(l == pl.num_programs(0) - 1)
    def _():
        pooled = jnp.concatenate(
            [x[b * seq:b * seq + 1, :] for b in range(bc)], axis=0)        # (2B, H)
        concat = jnp.concatenate([pooled[:n_pair], pooled[n_pair:]], axis=1)  # (B, 2H)
        # nn.Dropout(p=0.1) is identity at inference time.
        out_ref[...] = (jnp.dot(concat, clsw_ref[...],
                                preferred_element_type=jnp.float32)
                        + clsb_ref[...]).astype(out_ref.dtype)


# ------------------------------- model forward ---------------------------------
def double_input_bert_forward(params, input_ids, attention_mask, token_type_ids,
                              input_ids_2, attention_mask_2, token_type_ids_2):
    bp = params["bert"]
    B, S = input_ids.shape
    H, I, L, NL = CFG["hidden"], CFG["intermediate"], CFG["layers"], CFG["num_labels"]
    Bc = 2 * B
    BS = Bc * S

    # Batch the two encoder passes together (shared weights => identical math).
    ids = jnp.concatenate([input_ids, input_ids_2], axis=0)
    am = jnp.concatenate([attention_mask, attention_mask_2], axis=0).astype(jnp.float32)
    tt = jnp.concatenate([token_type_ids, token_type_ids_2], axis=0)

    # Embedding gathers are plain-JAX glue.
    x_emb = (bp["word_emb"][ids]
             + bp["pos_emb"][:S][None, :, :]
             + bp["type_emb"][tt]).reshape(BS, H).astype(jnp.float32)

    # Combined additive mask: block-diagonal over the 2*B sequences plus key padding
    # (cross-sequence keys get -10000, identical in effect to running batches apart).
    bidx = jnp.arange(BS, dtype=jnp.int32) // S
    same = bidx[:, None] == bidx[None, :]
    key_ok = am.reshape(BS) > 0.5
    mask_add = jnp.where(same & key_ok[None, :], 0.0, -10000.0).astype(jnp.float32)

    def full2(r, c):
        return pl.BlockSpec((r, c), lambda l: (0, 0))

    def per_layer(r, c):
        return pl.BlockSpec((None, r, c), lambda l: (l, 0, 0))

    kern = partial(_encoder_kernel, n_pair=B, seq=S, hidden=H,
                   heads=CFG["heads"], eps=CFG["eps"])

    logits = pl.pallas_call(
        kern,
        out_shape=jax.ShapeDtypeStruct((B, NL), jnp.float32),
        grid=(L,),
        in_specs=[
            full2(BS, BS),                 # attention mask (constant across layers)
            full2(BS, H),                  # embedding output
            full2(1, H), full2(1, H),      # embedding LayerNorm gamma / beta
            per_layer(H, 3 * H), per_layer(1, 3 * H),   # fused QKV
            per_layer(H, H), per_layer(1, H),           # attention output proj
            per_layer(1, H), per_layer(1, H),           # attention LayerNorm
            per_layer(H, I), per_layer(1, I),           # FFN intermediate
            per_layer(I, H), per_layer(1, H),           # FFN output
            per_layer(1, H), per_layer(1, H),           # FFN LayerNorm
            full2(2 * H, NL), full2(1, NL),             # classifier
        ],
        out_specs=pl.BlockSpec((B, NL), lambda l: (0, 0)),
        scratch_shapes=[pltpu.VMEM((BS, H), jnp.float32)],
        compiler_params=pltpu.CompilerParams(
            dimension_semantics=("arbitrary",)),        # sequential layer carry
    )(mask_add, x_emb, bp["emb_ln_g"], bp["emb_ln_b"],
      bp["wqkv"], bp["bqkv"], bp["wo"], bp["bo"], bp["ln1_g"], bp["ln1_b"],
      bp["wi"], bp["bi"], bp["wo2"], bp["bo2"], bp["ln2_g"], bp["ln2_b"],
      params["cls_w"], params["cls_b"])
    return logits


# ------------------------------ parameter init --------------------------------
def init_params(key):
    H, I, L = CFG["hidden"], CFG["intermediate"], CFG["layers"]
    keys = iter(jax.random.split(key, 64))

    def nrm(shape):
        return (0.02 * jax.random.normal(next(keys), shape)).astype(jnp.float32)

    bert = dict(
        word_emb=nrm((CFG["vocab"], H)),
        pos_emb=nrm((CFG["max_pos"], H)),
        type_emb=nrm((CFG["type_vocab"], H)),
        emb_ln_g=jnp.ones((1, H), jnp.float32),
        emb_ln_b=jnp.zeros((1, H), jnp.float32),
        # Per-layer weights stacked on a leading L axis; Q|K|V fused to (H, 3H).
        wqkv=nrm((L, H, 3 * H)),
        bqkv=jnp.zeros((L, 1, 3 * H), jnp.float32),
        wo=nrm((L, H, H)),
        bo=jnp.zeros((L, 1, H), jnp.float32),
        ln1_g=jnp.ones((L, 1, H), jnp.float32),
        ln1_b=jnp.zeros((L, 1, H), jnp.float32),
        wi=nrm((L, H, I)),
        bi=jnp.zeros((L, 1, I), jnp.float32),
        wo2=nrm((L, I, H)),
        bo2=jnp.zeros((L, 1, H), jnp.float32),
        ln2_g=jnp.ones((L, 1, H), jnp.float32),
        ln2_b=jnp.zeros((L, 1, H), jnp.float32),
    )
    return dict(
        bert=bert,
        cls_w=nrm((2 * H, CFG["num_labels"])),
        cls_b=jnp.zeros((1, CFG["num_labels"]), jnp.float32),
    )


# ----------------------------------- main --------------------------------------
if __name__ == "__main__":
    B, S = 2, 8
    key = jax.random.PRNGKey(0)
    k_param, k_ids1, k_ids2 = jax.random.split(key, 3)

    params = init_params(k_param)

    input_ids = jax.random.randint(k_ids1, (B, S), 0, CFG["vocab"], dtype=jnp.int32)
    input_ids_2 = jax.random.randint(k_ids2, (B, S), 0, CFG["vocab"], dtype=jnp.int32)
    attention_mask = jnp.ones((B, S), jnp.float32)
    attention_mask_2 = jnp.ones((B, S), jnp.float32).at[:, S - 2:].set(0.0)
    token_type_ids = jnp.zeros((B, S), jnp.int32)
    token_type_ids_2 = jnp.zeros((B, S), jnp.int32)

    fwd = jax.jit(double_input_bert_forward)
    logits = fwd(params, input_ids, attention_mask, token_type_ids,
                 input_ids_2, attention_mask_2, token_type_ids_2)
    logits = jax.block_until_ready(logits)

    assert logits.shape == (B, CFG["num_labels"])
    assert bool(jnp.all(jnp.isfinite(logits)))
    # TODO(synk): labels / CrossEntropyLoss branch omitted (inference-only forward).
    print("KERNEL_OK")
</pallas_src>

<mosaic_0001>
module attributes {stable_mosaic.version = 11 : i64} {
  func.func @_encoder_kernel(%arg0: i32, %arg1: memref<32x32xf32, #tpu.memory_space<vmem>>, %arg2: memref<32x32xf32, #tpu.memory_space<vmem>>, %arg3: memref<1x32xf32, #tpu.memory_space<vmem>>, %arg4: memref<1x32xf32, #tpu.memory_space<vmem>>, %arg5: memref<1x32x96xf32, #tpu.memory_space<vmem>>, %arg6: memref<1x1x96xf32, #tpu.memory_space<vmem>>, %arg7: memref<1x32x32xf32, #tpu.memory_space<vmem>>, %arg8: memref<1x1x32xf32, #tpu.memory_space<vmem>>, %arg9: memref<1x1x32xf32, #tpu.memory_space<vmem>>, %arg10: memref<1x1x32xf32, #tpu.memory_space<vmem>>, %arg11: memref<1x32x64xf32, #tpu.memory_space<vmem>>, %arg12: memref<1x1x64xf32, #tpu.memory_space<vmem>>, %arg13: memref<1x64x32xf32, #tpu.memory_space<vmem>>, %arg14: memref<1x1x32xf32, #tpu.memory_space<vmem>>, %arg15: memref<1x1x32xf32, #tpu.memory_space<vmem>>, %arg16: memref<1x1x32xf32, #tpu.memory_space<vmem>>, %arg17: memref<64x6xf32, #tpu.memory_space<vmem>>, %arg18: memref<1x6xf32, #tpu.memory_space<vmem>>, %arg19: memref<2x6xf32, #tpu.memory_space<vmem>>, %arg20: memref<32x32xf32, #tpu.memory_space<vmem>>) attributes {dimension_semantics = [#tpu.dimension_semantics<arbitrary>], iteration_bounds = array<i64: 2>, scalar_prefetch = 0 : i64, scratch_operands = 1 : i64, tpu.core_type = #tpu.core_type<tc>, window_params = [{pipeline_mode = #tpu.pipeline_mode<synchronous>, transform_indices = @transform_0, window_bounds = array<i64: 32, 32>}, {pipeline_mode = #tpu.pipeline_mode<synchronous>, transform_indices = @transform_1, window_bounds = array<i64: 32, 32>}, {pipeline_mode = #tpu.pipeline_mode<synchronous>, transform_indices = @transform_2, window_bounds = array<i64: 1, 32>}, {pipeline_mode = #tpu.pipeline_mode<synchronous>, transform_indices = @transform_3, window_bounds = array<i64: 1, 32>}, {transform_indices = @transform_4, window_bounds = array<i64: 1, 32, 96>}, {transform_indices = @transform_5, window_bounds = array<i64: 1, 1, 96>}, {transform_indices = @transform_6, window_bounds = array<i64: 1, 32, 32>}, {transform_indices = @transform_7, window_bounds = array<i64: 1, 1, 32>}, {transform_indices = @transform_8, window_bounds = array<i64: 1, 1, 32>}, {transform_indices = @transform_9, window_bounds = array<i64: 1, 1, 32>}, {transform_indices = @transform_10, window_bounds = array<i64: 1, 32, 64>}, {transform_indices = @transform_11, window_bounds = array<i64: 1, 1, 64>}, {transform_indices = @transform_12, window_bounds = array<i64: 1, 64, 32>}, {transform_indices = @transform_13, window_bounds = array<i64: 1, 1, 32>}, {transform_indices = @transform_14, window_bounds = array<i64: 1, 1, 32>}, {transform_indices = @transform_15, window_bounds = array<i64: 1, 1, 32>}, {pipeline_mode = #tpu.pipeline_mode<synchronous>, transform_indices = @transform_16, window_bounds = array<i64: 64, 6>}, {pipeline_mode = #tpu.pipeline_mode<synchronous>, transform_indices = @transform_17, window_bounds = array<i64: 1, 6>}, {pipeline_mode = #tpu.pipeline_mode<synchronous>, transform_indices = @transform_18, window_bounds = array<i64: 2, 6>}]} {
    %c0_i32 = arith.constant 0 : i32
    %0 = arith.cmpi eq, %arg0, %c0_i32 : i32
    %1 = arith.extui %0 : i1 to i32
    %c0_i32_0 = arith.constant 0 : i32
    %2 = arith.cmpi ne, %1, %c0_i32_0 : i32
    scf.if %2 {
      %c0_70 = arith.constant 0 : index
      %c0_71 = arith.constant 0 : index
      %137 = vector.load %arg2[%c0_70, %c0_71] : memref<32x32xf32, #tpu.memory_space<vmem>>, vector<32x32xf32>
      %c0_72 = arith.constant 0 : index
      %c0_73 = arith.constant 0 : index
      %138 = vector.load %arg3[%c0_72, %c0_73] : memref<1x32xf32, #tpu.memory_space<vmem>>, vector<1x32xf32>
      %c0_74 = arith.constant 0 : index
      %c0_75 = arith.constant 0 : index
      %139 = vector.load %arg4[%c0_74, %c0_75] : memref<1x32xf32, #tpu.memory_space<vmem>>, vector<1x32xf32>
      %cst_76 = arith.constant dense<0.000000e+00> : vector<32xf32>
      %140 = vector.multi_reduction <add>, %137, %cst_76 [1] : vector<32x32xf32> to vector<32xf32>
      %141 = vector.shape_cast %140 : vector<32xf32> to vector<32x1xf32>
      %cst_77 = arith.constant 3.200000e+01 : f32
      %142 = vector.broadcast %cst_77 : f32 to vector<32x1xf32>
      %143 = arith.divf %141, %142 : vector<32x1xf32>
      %144 = vector.broadcast %143 : vector<32x1xf32> to vector<32x32xf32>
      %145 = arith.subf %137, %144 : vector<32x32xf32>
      %146 = arith.mulf %145, %145 : vector<32x32xf32>
      %cst_78 = arith.constant dense<0.000000e+00> : vector<32xf32>
      %147 = vector.multi_reduction <add>, %146, %cst_78 [1] : vector<32x32xf32> to vector<32xf32>
      %148 = vector.shape_cast %147 : vector<32xf32> to vector<32x1xf32>
      %cst_79 = arith.constant 3.200000e+01 : f32
      %149 = vector.broadcast %cst_79 : f32 to vector<32x1xf32>
      %150 = arith.divf %148, %149 : vector<32x1xf32>
      %cst_80 = arith.constant 9.99999996E-13 : f32
      %151 = vector.broadcast %cst_80 : f32 to vector<32x1xf32>
      %152 = arith.addf %150, %151 : vector<32x1xf32>
      %153 = math.rsqrt %152 : vector<32x1xf32>
      %154 = vector.broadcast %153 : vector<32x1xf32> to vector<32x32xf32>
      %155 = arith.mulf %145, %154 : vector<32x32xf32>
      %156 = vector.broadcast %138 : vector<1x32xf32> to vector<32x32xf32>
      %157 = arith.mulf %155, %156 : vector<32x32xf32>
      %158 = vector.broadcast %139 : vector<1x32xf32> to vector<32x32xf32>
      %159 = arith.addf %157, %158 : vector<32x32xf32>
      %c0_81 = arith.constant 0 : index
      %c0_82 = arith.constant 0 : index
      %160 = vector.load %arg20[%c0_81, %c0_82] : memref<32x32xf32, #tpu.memory_space<vmem>>, vector<32x32xf32>
      tpu.vector_store %arg20[%c0_81, %c0_82], %159 {strides = array<i32>} : memref<32x32xf32, #tpu.memory_space<vmem>>, vector<32x32xf32>,
    } else {
    }
    %c0 = arith.constant 0 : index
    %c0_1 = arith.constant 0 : index
    %3 = vector.load %arg20[%c0, %c0_1] : memref<32x32xf32, #tpu.memory_space<vmem>>, vector<32x32xf32>
    %c0_2 = arith.constant 0 : index
    %c0_3 = arith.constant 0 : index
    %c0_4 = arith.constant 0 : index
    %4 = vector.load %arg5[%c0_2, %c0_3, %c0_4] : memref<1x32x96xf32, #tpu.memory_space<vmem>>, vector<1x32x96xf32>
    %5 = vector.shape_cast %4 : vector<1x32x96xf32> to vector<32x96xf32>
    %cst = arith.constant dense<0.000000e+00> : vector<32x96xf32>
    %6 = tpu.matmul %3, %5, %cst {dimension_numbers = #tpu.dot_dimension_numbers<[1], [0], [0], [1], [0, 0, 1, 1], [], []>} : vector<32x32xf32>, vector<32x96xf32>, vector<32x96xf32> -> vector<32x96xf32>
    %c0_5 = arith.constant 0 : index
    %c0_6 = arith.constant 0 : index
    %c0_7 = arith.constant 0 : index
    %7 = vector.load %arg6[%c0_5, %c0_6, %c0_7] : memref<1x1x96xf32, #tpu.memory_space<vmem>>, vector<1x1x96xf32>
    %8 = vector.shape_cast %7 : vector<1x1x96xf32> to vector<1x96xf32>
    %9 = vector.broadcast %8 : vector<1x96xf32> to vector<32x96xf32>
    %10 = arith.addf %6, %9 : vector<32x96xf32>
    %c0_8 = arith.constant 0 : index
    %c0_9 = arith.constant 0 : index
    %11 = vector.load %arg1[%c0_8, %c0_9] : memref<32x32xf32, #tpu.memory_space<vmem>>, vector<32x32xf32>
    %12 = vector.extract_strided_slice %10 {offsets = [0, 0], sizes = [32, 16], strides = [1, 1]} : vector<32x96xf32> to vector<32x16xf32>
    %13 = vector.extract_strided_slice %10 {offsets = [0, 32], sizes = [32, 16], strides = [1, 1]} : vector<32x96xf32> to vector<32x16xf32>
    %14 = vector.extract_strided_slice %10 {offsets = [0, 64], sizes = [32, 16], strides = [1, 1]} : vector<32x96xf32> to vector<32x16xf32>
    %cst_10 = arith.constant dense<0.000000e+00> : vector<32x32xf32>
    %15 = tpu.matmul %12, %13, %cst_10 {dimension_numbers = #tpu.dot_dimension_numbers<[1], [1], [0], [0], [0, 0, 1, 0], [], []>} : vector<32x16xf32>, vector<32x16xf32>, vector<32x32xf32> -> vector<32x32xf32>
    %cst_11 = arith.constant 2.500000e-01 : f32
    %16 = vector.broadcast %cst_11 : f32 to vector<32x32xf32>
    %17 = arith.mulf %15, %16 : vector<32x32xf32>
    %18 = arith.addf %17, %11 : vector<32x32xf32>
    %cst_12 = arith.constant dense<0xFF800000> : vector<32xf32>
    %19 = vector.multi_reduction <maximumf>, %18, %cst_12 [1] : vector<32x32xf32> to vector<32xf32>
    %20 = vector.shape_cast %19 : vector<32xf32> to vector<32x1xf32>
    %21 = vector.broadcast %20 : vector<32x1xf32> to vector<32x32xf32>
    %22 = arith.subf %18, %21 : vector<32x32xf32>
    %23 = math.exp %22 : vector<32x32xf32>
    %cst_13 = arith.constant dense<0.000000e+00> : vector<32xf32>
    %24 = vector.multi_reduction <add>, %23, %cst_13 [1] : vector<32x32xf32> to vector<32xf32>
    %25 = vector.shape_cast %24 : vector<32xf32> to vector<32x1xf32>
    %26 = tpu.reciprocal %25 {approx = true} : vector<32x1xf32> -> vector<32x1xf32>
    %27 = vector.broadcast %26 : vector<32x1xf32> to vector<32x32xf32>
    %28 = arith.mulf %23, %27 : vector<32x32xf32>
    %cst_14 = arith.constant dense<0.000000e+00> : vector<32x16xf32>
    %29 = tpu.matmul %28, %14, %cst_14 {dimension_numbers = #tpu.dot_dimension_numbers<[1], [0], [0], [1], [0, 0, 1, 1], [], []>} : vector<32x32xf32>, vector<32x16xf32>, vector<32x16xf32> -> vector<32x16xf32>
    %30 = vector.extract_strided_slice %10 {offsets = [0, 16], sizes = [32, 16], strides = [1, 1]} : vector<32x96xf32> to vector<32x16xf32>
    %31 = vector.extract_strided_slice %10 {offsets = [0, 48], sizes = [32, 16], strides = [1, 1]} : vector<32x96xf32> to vector<32x16xf32>
    %32 = vector.extract_strided_slice %10 {offsets = [0, 80], sizes = [32, 16], strides = [1, 1]} : vector<32x96xf32> to vector<32x16xf32>
    %cst_15 = arith.constant dense<0.000000e+00> : vector<32x32xf32>
    %33 = tpu.matmul %30, %31, %cst_15 {dimension_numbers = #tpu.dot_dimension_numbers<[1], [1], [0], [0], [0, 0, 1, 0], [], []>} : vector<32x16xf32>, vector<32x16xf32>, vector<32x32xf32> -> vector<32x32xf32>
    %cst_16 = arith.constant 2.500000e-01 : f32
    %34 = vector.broadcast %cst_16 : f32 to vector<32x32xf32>
    %35 = arith.mulf %33, %34 : vector<32x32xf32>
    %36 = arith.addf %35, %11 : vector<32x32xf32>
    %cst_17 = arith.constant dense<0xFF800000> : vector<32xf32>
    %37 = vector.multi_reduction <maximumf>, %36, %cst_17 [1] : vector<32x32xf32> to vector<32xf32>
    %38 = vector.shape_cast %37 : vector<32xf32> to vector<32x1xf32>
    %39 = vector.broadcast %38 : vector<32x1xf32> to vector<32x32xf32>
    %40 = arith.subf %36, %39 : vector<32x32xf32>
    %41 = math.exp %40 : vector<32x32xf32>
    %cst_18 = arith.constant dense<0.000000e+00> : vector<32xf32>
    %42 = vector.multi_reduction <add>, %41, %cst_18 [1] : vector<32x32xf32> to vector<32xf32>
    %43 = vector.shape_cast %42 : vector<32xf32> to vector<32x1xf32>
    %44 = tpu.reciprocal %43 {approx = true} : vector<32x1xf32> -> vector<32x1xf32>
    %45 = vector.broadcast %44 : vector<32x1xf32> to vector<32x32xf32>
    %46 = arith.mulf %41, %45 : vector<32x32xf32>
    %cst_19 = arith.constant dense<0.000000e+00> : vector<32x16xf32>
    %47 = tpu.matmul %46, %32, %cst_19 {dimension_numbers = #tpu.dot_dimension_numbers<[1], [0], [0], [1], [0, 0, 1, 1], [], []>} : vector<32x32xf32>, vector<32x16xf32>, vector<32x16xf32> -> vector<32x16xf32>
    %48 = tpu.concatenate %29, %47 in 1 : vector<32x16xf32>, vector<32x16xf32> -> vector<32x32xf32>
    %c0_20 = arith.constant 0 : index
    %c0_21 = arith.constant 0 : index
    %c0_22 = arith.constant 0 : index
    %49 = vector.load %arg7[%c0_20, %c0_21, %c0_22] : memref<1x32x32xf32, #tpu.memory_space<vmem>>, vector<1x32x32xf32>
    %50 = vector.shape_cast %49 : vector<1x32x32xf32> to vector<32x32xf32>
    %cst_23 = arith.constant dense<0.000000e+00> : vector<32x32xf32>
    %51 = tpu.matmul %48, %50, %cst_23 {dimension_numbers = #tpu.dot_dimension_numbers<[1], [0], [0], [1], [0, 0, 1, 1], [], []>} : vector<32x32xf32>, vector<32x32xf32>, vector<32x32xf32> -> vector<32x32xf32>
    %c0_24 = arith.constant 0 : index
    %c0_25 = arith.constant 0 : index
    %c0_26 = arith.constant 0 : index
    %52 = vector.load %arg8[%c0_24, %c0_25, %c0_26] : memref<1x1x32xf32, #tpu.memory_space<vmem>>, vector<1x1x32xf32>
    %53 = vector.shape_cast %52 : vector<1x1x32xf32> to vector<1x32xf32>
    %54 = vector.broadcast %53 : vector<1x32xf32> to vector<32x32xf32>
    %55 = arith.addf %51, %54 : vector<32x32xf32>
    %56 = arith.addf %55, %3 : vector<32x32xf32>
    %c0_27 = arith.constant 0 : index
    %c0_28 = arith.constant 0 : index
    %c0_29 = arith.constant 0 : index
    %57 = vector.load %arg9[%c0_27, %c0_28, %c0_29] : memref<1x1x32xf32, #tpu.memory_space<vmem>>, vector<1x1x32xf32>
    %58 = vector.shape_cast %57 : vector<1x1x32xf32> to vector<1x32xf32>
    %c0_30 = arith.constant 0 : index
    %c0_31 = arith.constant 0 : index
    %c0_32 = arith.constant 0 : index
    %59 = vector.load %arg10[%c0_30, %c0_31, %c0_32] : memref<1x1x32xf32, #tpu.memory_space<vmem>>, vector<1x1x32xf32>
    %60 = vector.shape_cast %59 : vector<1x1x32xf32> to vector<1x32xf32>
    %cst_33 = arith.constant dense<0.000000e+00> : vector<32xf32>
    %61 = vector.multi_reduction <add>, %56, %cst_33 [1] : vector<32x32xf32> to vector<32xf32>
    %62 = vector.shape_cast %61 : vector<32xf32> to vector<32x1xf32>
    %cst_34 = arith.constant 3.200000e+01 : f32
    %63 = vector.broadcast %cst_34 : f32 to vector<32x1xf32>
    %64 = arith.divf %62, %63 : vector<32x1xf32>
    %65 = vector.broadcast %64 : vector<32x1xf32> to vector<32x32xf32>
    %66 = arith.subf %56, %65 : vector<32x32xf32>
    %67 = arith.mulf %66, %66 : vector<32x32xf32>
    %cst_35 = arith.constant dense<0.000000e+00> : vector<32xf32>
    %68 = vector.multi_reduction <add>, %67, %cst_35 [1] : vector<32x32xf32> to vector<32xf32>
    %69 = vector.shape_cast %68 : vector<32xf32> to vector<32x1xf32>
    %cst_36 = arith.constant 3.200000e+01 : f32
    %70 = vector.broadcast %cst_36 : f32 to vector<32x1xf32>
    %71 = arith.divf %69, %70 : vector<32x1xf32>
    %cst_37 = arith.constant 9.99999996E-13 : f32
    %72 = vector.broadcast %cst_37 : f32 to vector<32x1xf32>
    %73 = arith.addf %71, %72 : vector<32x1xf32>
    %74 = math.rsqrt %73 : vector<32x1xf32>
    %75 = vector.broadcast %74 : vector<32x1xf32> to vector<32x32xf32>
    %76 = arith.mulf %66, %75 : vector<32x32xf32>
    %77 = vector.broadcast %58 : vector<1x32xf32> to vector<32x32xf32>
    %78 = arith.mulf %76, %77 : vector<32x32xf32>
    %79 = vector.broadcast %60 : vector<1x32xf32> to vector<32x32xf32>
    %80 = arith.addf %78, %79 : vector<32x32xf32>
    %c0_38 = arith.constant 0 : index
    %c0_39 = arith.constant 0 : index
    %c0_40 = arith.constant 0 : index
    %81 = vector.load %arg11[%c0_38, %c0_39, %c0_40] : memref<1x32x64xf32, #tpu.memory_space<vmem>>, vector<1x32x64xf32>
    %82 = vector.shape_cast %81 : vector<1x32x64xf32> to vector<32x64xf32>
    %cst_41 = arith.constant dense<0.000000e+00> : vector<32x64xf32>
    %83 = tpu.matmul %80, %82, %cst_41 {dimension_numbers = #tpu.dot_dimension_numbers<[1], [0], [0], [1], [0, 0, 1, 1], [], []>} : vector<32x32xf32>, vector<32x64xf32>, vector<32x64xf32> -> vector<32x64xf32>
    %c0_42 = arith.constant 0 : index
    %c0_43 = arith.constant 0 : index
    %c0_44 = arith.constant 0 : index
    %84 = vector.load %arg12[%c0_42, %c0_43, %c0_44] : memref<1x1x64xf32, #tpu.memory_space<vmem>>, vector<1x1x64xf32>
    %85 = vector.shape_cast %84 : vector<1x1x64xf32> to vector<1x64xf32>
    %86 = vector.broadcast %85 : vector<1x64xf32> to vector<32x64xf32>
    %87 = arith.addf %83, %86 : vector<32x64xf32>
    %cst_45 = arith.constant 5.000000e-01 : f32
    %88 = vector.broadcast %cst_45 : f32 to vector<32x64xf32>
    %89 = arith.mulf %88, %87 : vector<32x64xf32>
    %cst_46 = arith.constant 4.471500e-02 : f32
    %90 = vector.broadcast %cst_46 : f32 to vector<32x64xf32>
    %91 = arith.mulf %90, %87 : vector<32x64xf32>
    %92 = arith.mulf %91, %87 : vector<32x64xf32>
    %93 = arith.mulf %92, %87 : vector<32x64xf32>
    %94 = arith.addf %87, %93 : vector<32x64xf32>
    %cst_47 = arith.constant 0.797884583 : f32
    %95 = vector.broadcast %cst_47 : f32 to vector<32x64xf32>
    %96 = arith.mulf %95, %94 : vector<32x64xf32>
    %97 = math.tanh %96 : vector<32x64xf32>
    %cst_48 = arith.constant 1.000000e+00 : f32
    %98 = vector.broadcast %cst_48 : f32 to vector<32x64xf32>
    %99 = arith.addf %98, %97 : vector<32x64xf32>
    %100 = arith.mulf %89, %99 : vector<32x64xf32>
    %c0_49 = arith.constant 0 : index
    %c0_50 = arith.constant 0 : index
    %c0_51 = arith.constant 0 : index
    %101 = vector.load %arg13[%c0_49, %c0_50, %c0_51] : memref<1x64x32xf32, #tpu.memory_space<vmem>>, vector<1x64x32xf32>
    %102 = vector.shape_cast %101 : vector<1x64x32xf32> to vector<64x32xf32>
    %cst_52 = arith.constant dense<0.000000e+00> : vector<32x32xf32>
    %103 = tpu.matmul %100, %102, %cst_52 {dimension_numbers = #tpu.dot_dimension_numbers<[1], [0], [0], [1], [0, 0, 1, 1], [], []>} : vector<32x64xf32>, vector<64x32xf32>, vector<32x32xf32> -> vector<32x32xf32>
    %c0_53 = arith.constant 0 : index
    %c0_54 = arith.constant 0 : index
    %c0_55 = arith.constant 0 : index
    %104 = vector.load %arg14[%c0_53, %c0_54, %c0_55] : memref<1x1x32xf32, #tpu.memory_space<vmem>>, vector<1x1x32xf32>
    %105 = vector.shape_cast %104 : vector<1x1x32xf32> to vector<1x32xf32>
    %106 = vector.broadcast %105 : vector<1x32xf32> to vector<32x32xf32>
    %107 = arith.addf %103, %106 : vector<32x32xf32>
    %108 = arith.addf %107, %80 : vector<32x32xf32>
    %c0_56 = arith.constant 0 : index
    %c0_57 = arith.constant 0 : index
    %c0_58 = arith.constant 0 : index
    %109 = vector.load %arg15[%c0_56, %c0_57, %c0_58] : memref<1x1x32xf32, #tpu.memory_space<vmem>>, vector<1x1x32xf32>
    %110 = vector.shape_cast %109 : vector<1x1x32xf32> to vector<1x32xf32>
    %c0_59 = arith.constant 0 : index
    %c0_60 = arith.constant 0 : index
    %c0_61 = arith.constant 0 : index
    %111 = vector.load %arg16[%c0_59, %c0_60, %c0_61] : memref<1x1x32xf32, #tpu.memory_space<vmem>>, vector<1x1x32xf32>
    %112 = vector.shape_cast %111 : vector<1x1x32xf32> to vector<1x32xf32>
    %cst_62 = arith.constant dense<0.000000e+00> : vector<32xf32>
    %113 = vector.multi_reduction <add>, %108, %cst_62 [1] : vector<32x32xf32> to vector<32xf32>
    %114 = vector.shape_cast %113 : vector<32xf32> to vector<32x1xf32>
    %cst_63 = arith.constant 3.200000e+01 : f32
    %115 = vector.broadcast %cst_63 : f32 to vector<32x1xf32>
    %116 = arith.divf %114, %115 : vector<32x1xf32>
    %117 = vector.broadcast %116 : vector<32x1xf32> to vector<32x32xf32>
    %118 = arith.subf %108, %117 : vector<32x32xf32>
    %119 = arith.mulf %118, %118 : vector<32x32xf32>
    %cst_64 = arith.constant dense<0.000000e+00> : vector<32xf32>
    %120 = vector.multi_reduction <add>, %119, %cst_64 [1] : vector<32x32xf32> to vector<32xf32>
    %121 = vector.shape_cast %120 : vector<32xf32> to vector<32x1xf32>
    %cst_65 = arith.constant 3.200000e+01 : f32
    %122 = vector.broadcast %cst_65 : f32 to vector<32x1xf32>
    %123 = arith.divf %121, %122 : vector<32x1xf32>
    %cst_66 = arith.constant 9.99999996E-13 : f32
    %124 = vector.broadcast %cst_66 : f32 to vector<32x1xf32>
    %125 = arith.addf %123, %124 : vector<32x1xf32>
    %126 = math.rsqrt %125 : vector<32x1xf32>
    %127 = vector.broadcast %126 : vector<32x1xf32> to vector<32x32xf32>
    %128 = arith.mulf %118, %127 : vector<32x32xf32>
    %129 = vector.broadcast %110 : vector<1x32xf32> to vector<32x32xf32>
    %130 = arith.mulf %128, %129 : vector<32x32xf32>
    %131 = vector.broadcast %112 : vector<1x32xf32> to vector<32x32xf32>
    %132 = arith.addf %130, %131 : vector<32x32xf32>
    %c0_67 = arith.constant 0 : index
    %c0_68 = arith.constant 0 : index
    %133 = vector.load %arg20[%c0_67, %c0_68] : memref<32x32xf32, #tpu.memory_space<vmem>>, vector<32x32xf32>
    tpu.vector_store %arg20[%c0_67, %c0_68], %132 {strides = array<i32>} : memref<32x32xf32, #tpu.memory_space<vmem>>, vector<32x32xf32>,
    %c1_i32 = arith.constant 1 : i32
    %134 = arith.cmpi eq, %arg0, %c1_i32 : i32
    %135 = arith.extui %134 : i1 to i32
    %c0_i32_69 = arith.constant 0 : i32
    %136 = arith.cmpi ne, %135, %c0_i32_69 : i32
    scf.if %136 {
      %137 = vector.extract_strided_slice %132 {offsets = [0, 0], sizes = [1, 32], strides = [1, 1]} : vector<32x32xf32> to vector<1x32xf32>
      %138 = vector.extract_strided_slice %132 {offsets = [8, 0], sizes = [1, 32], strides = [1, 1]} : vector<32x32xf32> to vector<1x32xf32>
      %139 = vector.extract_strided_slice %132 {offsets = [16, 0], sizes = [1, 32], strides = [1, 1]} : vector<32x32xf32> to vector<1x32xf32>
      %140 = vector.extract_strided_slice %132 {offsets = [24, 0], sizes = [1, 32], strides = [1, 1]} : vector<32x32xf32> to vector<1x32xf32>
      %141 = tpu.concatenate %137, %138, %139, %140 in 0 : vector<1x32xf32>, vector<1x32xf32>, vector<1x32xf32>, vector<1x32xf32> -> vector<4x32xf32>
      %142 = vector.extract_strided_slice %141 {offsets = [0, 0], sizes = [2, 32], strides = [1, 1]} : vector<4x32xf32> to vector<2x32xf32>
      %143 = vector.extract_strided_slice %141 {offsets = [2, 0], sizes = [2, 32], strides = [1, 1]} : vector<4x32xf32> to vector<2x32xf32>
      %144 = tpu.concatenate %142, %143 in 1 : vector<2x32xf32>, vector<2x32xf32> -> vector<2x64xf32>
      %c0_70 = arith.constant 0 : index
      %c0_71 = arith.constant 0 : index
      %145 = vector.load %arg17[%c0_70, %c0_71] : memref<64x6xf32, #tpu.memory_space<vmem>>, vector<64x6xf32>
      %cst_72 = arith.constant dense<0.000000e+00> : vector<2x6xf32>
      %146 = tpu.matmul %144, %145, %cst_72 {dimension_numbers = #tpu.dot_dimension_numbers<[1], [0], [0], [1], [0, 0, 1, 1], [], []>} : vector<2x64xf32>, vector<64x6xf32>, vector<2x6xf32> -> vector<2x6xf32>
      %c0_73 = arith.constant 0 : index
      %c0_74 = arith.constant 0 : index
      %147 = vector.load %arg18[%c0_73, %c0_74] : memref<1x6xf32, #tpu.memory_space<vmem>>, vector<1x6xf32>
      %148 = vector.broadcast %147 : vector<1x6xf32> to vector<2x6xf32>
      %149 = arith.addf %146, %148 : vector<2x6xf32>
      %c0_75 = arith.constant 0 : index
      %c0_76 = arith.constant 0 : index
      %150 = vector.load %arg19[%c0_75, %c0_76] : memref<2x6xf32, #tpu.memory_space<vmem>>, vector<2x6xf32>
      tpu.vector_store %arg19[%c0_75, %c0_76], %149 {strides = array<i32>} : memref<2x6xf32, #tpu.memory_space<vmem>>, vector<2x6xf32>,
    } else {
    }
    return
  }
  func.func @transform_0(%arg0: i32) -> (i32, i32) {
    %c0_i32 = arith.constant 0 : i32
    %c0_i32_0 = arith.constant 0 : i32
    %c0_i32_1 = arith.constant 0 : i32
    return %c0_i32, %c0_i32_0 : i32, i32
  }
  func.func @transform_1(%arg0: i32) -> (i32, i32) {
    %c0_i32 = arith.constant 0 : i32
    %c0_i32_0 = arith.constant 0 : i32
    %c0_i32_1 = arith.constant 0 : i32
    return %c0_i32, %c0_i32_0 : i32, i32
  }
  func.func @transform_2(%arg0: i32) -> (i32, i32) {
    %c0_i32 = arith.constant 0 : i32
    %c0_i32_0 = arith.constant 0 : i32
    %c0_i32_1 = arith.constant 0 : i32
    return %c0_i32, %c0_i32_0 : i32, i32
  }
  func.func @transform_3(%arg0: i32) -> (i32, i32) {
    %c0_i32 = arith.constant 0 : i32
    %c0_i32_0 = arith.constant 0 : i32
    %c0_i32_1 = arith.constant 0 : i32
    return %c0_i32, %c0_i32_0 : i32, i32
  }
  func.func @transform_4(%arg0: i32) -> (i32, i32, i32) {
    %c0_i32 = arith.constant 0 : i32
    %c0_i32_0 = arith.constant 0 : i32
    %c0_i32_1 = arith.constant 0 : i32
    return %arg0, %c0_i32, %c0_i32_0 : i32, i32, i32
  }
  func.func @transform_5(%arg0: i32) -> (i32, i32, i32) {
    %c0_i32 = arith.constant 0 : i32
    %c0_i32_0 = arith.constant 0 : i32
    %c0_i32_1 = arith.constant 0 : i32
    return %arg0, %c0_i32, %c0_i32_0 : i32, i32, i32
  }
  func.func @transform_6(%arg0: i32) -> (i32, i32, i32) {
    %c0_i32 = arith.constant 0 : i32
    %c0_i32_0 = arith.constant 0 : i32
    %c0_i32_1 = arith.constant 0 : i32
    return %arg0, %c0_i32, %c0_i32_0 : i32, i32, i32
  }
  func.func @transform_7(%arg0: i32) -> (i32, i32, i32) {
    %c0_i32 = arith.constant 0 : i32
    %c0_i32_0 = arith.constant 0 : i32
    %c0_i32_1 = arith.constant 0 : i32
    return %arg0, %c0_i32, %c0_i32_0 : i32, i32, i32
  }
  func.func @transform_8(%arg0: i32) -> (i32, i32, i32) {
    %c0_i32 = arith.constant 0 : i32
    %c0_i32_0 = arith.constant 0 : i32
    %c0_i32_1 = arith.constant 0 : i32
    return %arg0, %c0_i32, %c0_i32_0 : i32, i32, i32
  }
  func.func @transform_9(%arg0: i32) -> (i32, i32, i32) {
    %c0_i32 = arith.constant 0 : i32
    %c0_i32_0 = arith.constant 0 : i32
    %c0_i32_1 = arith.constant 0 : i32
    return %arg0, %c0_i32, %c0_i32_0 : i32, i32, i32
  }
  func.func @transform_10(%arg0: i32) -> (i32, i32, i32) {
    %c0_i32 = arith.constant 0 : i32
    %c0_i32_0 = arith.constant 0 : i32
    %c0_i32_1 = arith.constant 0 : i32
    return %arg0, %c0_i32, %c0_i32_0 : i32, i32, i32
  }
  func.func @transform_11(%arg0: i32) -> (i32, i32, i32) {
    %c0_i32 = arith.constant 0 : i32
    %c0_i32_0 = arith.constant 0 : i32
    %c0_i32_1 = arith.constant 0 : i32
    return %arg0, %c0_i32, %c0_i32_0 : i32, i32, i32
  }
  func.func @transform_12(%arg0: i32) -> (i32, i32, i32) {
    %c0_i32 = arith.constant 0 : i32
    %c0_i32_0 = arith.constant 0 : i32
    %c0_i32_1 = arith.constant 0 : i32
    return %arg0, %c0_i32, %c0_i32_0 : i32, i32, i32
  }
  func.func @transform_13(%arg0: i32) -> (i32, i32, i32) {
    %c0_i32 = arith.constant 0 : i32
    %c0_i32_0 = arith.constant 0 : i32
    %c0_i32_1 = arith.constant 0 : i32
    return %arg0, %c0_i32, %c0_i32_0 : i32, i32, i32
  }
  func.func @transform_14(%arg0: i32) -> (i32, i32, i32) {
    %c0_i32 = arith.constant 0 : i32
    %c0_i32_0 = arith.constant 0 : i32
    %c0_i32_1 = arith.constant 0 : i32
    return %arg0, %c0_i32, %c0_i32_0 : i32, i32, i32
  }
  func.func @transform_15(%arg0: i32) -> (i32, i32, i32) {
    %c0_i32 = arith.constant 0 : i32
    %c0_i32_0 = arith.constant 0 : i32
    %c0_i32_1 = arith.constant 0 : i32
    return %arg0, %c0_i32, %c0_i32_0 : i32, i32, i32
  }
  func.func @transform_16(%arg0: i32) -> (i32, i32) {
    %c0_i32 = arith.constant 0 : i32
    %c0_i32_0 = arith.constant 0 : i32
    %c0_i32_1 = arith.constant 0 : i32
    return %c0_i32, %c0_i32_0 : i32, i32
  }
  func.func @transform_17(%arg0: i32) -> (i32, i32) {
    %c0_i32 = arith.constant 0 : i32
    %c0_i32_0 = arith.constant 0 : i32
    %c0_i32_1 = arith.constant 0 : i32
    return %c0_i32, %c0_i32_0 : i32, i32
  }
  func.func @transform_18(%arg0: i32) -> (i32, i32) {
    %c0_i32 = arith.constant 0 : i32
    %c0_i32_0 = arith.constant 0 : i32
    %c0_i32_1 = arith.constant 0 : i32
    return %c0_i32, %c0_i32_0 : i32, i32
  }
}

</mosaic_0001>

<bundles_post_ra>
// kernel: double_input_bert_forward.1
= control target key start
LH: loop header
LB: loop body
LE: loop exit
PB: predicated region body
PF: predicated region fallthrough
CT: control target
= control target key end

     0   :  { %s3369_s0 = inlined_call_operand.vmem [shape: f32[32,32], index: 0, kind: input, shape index: {}]   ;;  %s3370_s1 = inlined_call_operand.vmem [shape: f32[32,32], index: 1, kind: input, shape index: {}]   ;;  %s3371_s2 = inlined_call_operand.vmem [shape: f32[1,32], index: 2, kind: input, shape index: {}]   ;;  %s3372_s3 = inlined_call_operand.vmem [shape: f32[1,32], index: 3, kind: input, shape index: {}]   ;;  %s3373_s4 = inlined_call_operand.vmem [shape: f32[2,32,96], index: 4, kind: input, shape index: {}]   ;;  %s3374_s5 = inlined_call_operand.vmem [shape: f32[2,1,96], index: 5, kind: input, shape index: {}]   ;;  %s3375_s6 = inlined_call_operand.vmem [shape: f32[2,32,32], index: 6, kind: input, shape index: {}]   ;;  %s3376_s7 = inlined_call_operand.vmem [shape: f32[2,1,32], index: 7, kind: input, shape index: {}]   ;;  %s3377_s8 = inlined_call_operand.vmem [shape: f32[2,1,32], index: 8, kind: input, shape index: {}]   ;;  %s3378_s9 = inlined_call_operand.vmem [shape: f32[2,1,32], index: 9, kind: input, shape index: {}]   ;;  %s3379_s10 = inlined_call_operand.vmem [shape: f32[2,32,64], index: 10, kind: input, shape index: {}]   ;;  %s3380_s11 = inlined_call_operand.vmem [shape: f32[2,1,64], index: 11, kind: input, shape index: {}]   ;;  %s3381_s12 = inlined_call_operand.vmem [shape: f32[2,64,32], index: 12, kind: input, shape index: {}]   ;;  %s3382_s13 = inlined_call_operand.vmem [shape: f32[2,1,32], index: 13, kind: input, shape index: {}]   ;;  %s3383_s14 = inlined_call_operand.vmem [shape: f32[2,1,32], index: 14, kind: input, shape index: {}]   ;;  %s3384_s15 = inlined_call_operand.vmem [shape: f32[2,1,32], index: 15, kind: input, shape index: {}]   ;;  %s3385_s16 = inlined_call_operand.vmem [shape: f32[64,6], index: 16, kind: input, shape index: {}]   ;;  %s3386_s17 = inlined_call_operand.vmem [shape: f32[1,6], index: 17, kind: input, shape index: {}]   ;;  %s3387_s18 = inlined_call_operand.hbm [shape: f32[2,6], index: 18, kind: output, shape index: {}]  }
   0x1   :  { %3394 = sst [smem:[#allocation8_spill]] %s3369_s0 }
   0x2   :  { %3395 = sst [smem:[#allocation9_spill]] %s3370_s1 }
   0x3   :  { %3396 = sst [smem:[#allocation10_spill]] %s3371_s2 }
   0x4   :  { %3397 = sst [smem:[#allocation11_spill]] %s3373_s4 }
   0x5   :  { %3398 = sst [smem:[#allocation12_spill]] %s3375_s6 }
   0x6   :  { %3399 = sst [smem:[#allocation13_spill]] %s3385_s16 }
   0x7   :  { %3400 = sst [smem:[#allocation14_spill]] %s3386_s17 }
   0x8   :  { %3401 = sst [smem:[#allocation15_spill]] %s3387_s18 }
   0x9   :  { %23 = vsyncpa [#allocation4], 0  ;;  %s2962_s27 = smov 0  }
   0xa LB: > { %3402 = sst [smem:[#allocation6_spill]] %s2854_s27  ;;  %s2968_s28 = sadd.s32 4294967295, %s2854_s27   ;;  %s2854_s27 = sphi %s2962_s27, %s29_s27  }
   0xb   : > { %p2310_p0 = scmp.ge.s32.totalorder %s2854_s27, 1  ;;  %p602_p1 = scmp.lt.s32.totalorder %s2854_s27, 3 }
   0xd   : > { %p603_p2 = pnand %p2310_p0, %p602_p1 }
   0xf   : > { %606 = sbr.rel (%p603_p2) target bundleno = 3861 (0xf15), region = 92 }
  0x16   : > { %p690_p3 = scmp.lt.s32.totalorder %s2968_s28, 1  ;;  %s3403_s4 = sld [smem:[#allocation11_spill]] }
  0x17   : > { %s3404_s6 = sld [smem:[#allocation12_spill]]  ;;  %p2319_p4 = scmp.ne.s32.totalorder %s2968_s28, 0 }
  0x18   : > { %s2974_s29 = scalar_select %p690_p3, %s2968_s28, 1 }
  0x19   : > { %737 = sbr.rel (%p2319_p4) target bundleno = 354 (0x162), region = 96  ;;  %s3406_s25 = sld [smem:[#allocation9_spill]] (!%p2319_p4)  ;;  %vm744_vm0 = vcmask (!%p2319_p4), 261120   ;;  %v2321_v43 = vld [vmem:[%s3372_s3] ss:$0 sm:$0xff] (!%p2319_p4) }
  0x1a   : > { %s2377_s30 = sshll.u32 %s2974_s29, 5  ;;  %s727_s0 = scalar_lea.vmem %s3382_s13, %s2974_s29 }
  0x1b   : > { %s730_s20 = scalar_lea.vmem %s3383_s14, %s2974_s29  ;;  %s733_s16 = scalar_lea.vmem %s3384_s15, %s2974_s29 }
  0x1c   : > { %s2984_s22 = scalar_lea.vmem %s3403_s4, %s2377_s30  ;;  %s3006_s4 = scalar_lea.vmem %s3379_s10, %s2377_s30 }
  0x1d   : > { %s2989_s24 = scalar_lea.vmem %s3404_s6, %s2377_s30  ;;  %s719_s6 = scalar_lea.vmem %s3380_s11, %s2974_s29 }
  0x1e   : > { %3405 = sst [smem:[#allocation7_spill]] %s2989_s24  ;;  %s2380_s24 = sshll.u32 %s2974_s29, 6 }
  0x1f   : > { %s3016_s27 = scalar_lea.vmem %s3381_s12, %s2380_s24  ;;  %v738_v0 = vld [vmem:[%s3406_s25] sm:$0xff] (!%p2319_p4)  ;;  %v740_v1 = vld [vmem:[%s3406_s25 + $0x10] sm:$0xff] (!%p2319_p4)  ;;  %v739_v2 = vld [vmem:[%s3406_s25 + $0x8] sm:$0xff] (!%p2319_p4)  ;;  %s3407_s2 = sld [smem:[#allocation10_spill]] (!%p2319_p4) }
  0x20   : > { %v745_v3 = vsel %vm744_vm0, %v738_v0, 0.0  ;;  %v751_v4 = vsel %vm744_vm0, %v740_v1, 0.0  ;;  %v741_v5 = vld [vmem:[%s3406_s25 + $0x18] sm:$0xff]  ;;  %v748_v6 = vsel %vm744_vm0, %v739_v2, 0.0 }
  0x21   : > { %746 = vadd.xlane.f32.xlu0 %v745_v3  ;;  %752 = vadd.xlane.f32.xlu1 %v751_v4  ;;  %v754_v7 = vsel %vm744_vm0, %v741_v5, 0.0 }
  0x25   : > { %749 = vadd.xlane.f32.xlu0 %v748_v6  ;;  %755 = vadd.xlane.f32.xlu1 %v754_v7  ;;  %v2320_v41 = vld [vmem:[%s3407_s2] ss:$0 sm:$0xff] }
  0xae   : > { %v747_v8 = vpop.xlane.xlu0 %746  ;;  %v753_v9 = vpop.xlane.xlu1 %752 }
  0xaf   : > { %v758_v10 = vmul.f32 0.03125, %v747_v8  ;;  %v760_v11 = vmul.f32 0.03125, %v753_v9 }
  0xb1   : > { %v762_v12 = vsub.f32 %v738_v0, %v758_v10  ;;  %v764_v13 = vsub.f32 %v740_v1, %v760_v11 }
  0xb2   : > { %v750_v14 = vpop.xlane.xlu0 %749  ;;  %v756_v15 = vpop.xlane.xlu1 %755 }
  0xb3   : > { %v759_v16 = vmul.f32 0.03125, %v750_v14  ;;  %v761_v17 = vmul.f32 0.03125, %v756_v15  ;;  %v766_v18 = vmul.f32 %v762_v12, %v762_v12  ;;  %v768_v19 = vmul.f32 %v764_v13, %v764_v13 }
  0xb5   : > { %v763_v20 = vsub.f32 %v739_v2, %v759_v16  ;;  %v765_v21 = vsub.f32 %v741_v5, %v761_v17  ;;  %v770_v22 = vsel %vm744_vm0, %v766_v18, 0.0  ;;  %v776_v23 = vsel %vm744_vm0, %v768_v19, 0.0 }
  0xb6   : > { %771 = vadd.xlane.f32.xlu0 %v770_v22 }
  0xb7   : > { %v767_v24 = vmul.f32 %v763_v20, %v763_v20  ;;  %v769_v25 = vmul.f32 %v765_v21, %v765_v21 }
  0xb9   : > { %v773_v26 = vsel %vm744_vm0, %v767_v24, 0.0  ;;  %v779_v27 = vsel %vm744_vm0, %v769_v25, 0.0 }
  0xba   : > { %777 = vadd.xlane.f32.xlu0 %v776_v23  ;;  %774 = vadd.xlane.f32.xlu1 %v773_v26 }
  0xbe   : > { %780 = vadd.xlane.f32.xlu1 %v779_v27 }
 0x143   : > { %v772_v28 = vpop.xlane.xlu0 %771 }
 0x144   : > { %v782_v29 = vmul.f32 0.03125, %v772_v28 }
 0x146   : > { %v786_v30 = vadd.f32 1e-12, %v782_v29 }
 0x147   : > { %v775_v31 = vpop.xlane.xlu1 %774  ;;  %v778_v32 = vpop.xlane.xlu0 %777 }
 0x148   : > { %2714 = vrsqrt.f32 %v786_v30  ;;  %v783_v33 = vmul.f32 0.03125, %v775_v31  ;;  %v784_v34 = vmul.f32 0.03125, %v778_v32 }
 0x14a   : > { %v787_v35 = vadd.f32 1e-12, %v783_v33  ;;  %v788_v36 = vadd.f32 1e-12, %v784_v34 }
 0x14b   : > { %v781_v37 = vpop.xlane.xlu1 %780 }
 0x14c   : > { %2716 = vrsqrt.f32 %v787_v35  ;;  %v785_v38 = vmul.f32 0.03125, %v781_v37 }
 0x14d   : > { %2718 = vrsqrt.f32 %v788_v36 }
 0x14e   : > { %v789_v39 = vadd.f32 1e-12, %v785_v38 }
 0x150   : > { %2720 = vrsqrt.f32 %v789_v39 }
 0x152   : > { %v2715_v40 = vpop.eup %2714 }
 0x153   : > { %v794_v42 = vmul.f32 %v2715_v40, %v762_v12 }
 0x155   : > { %v804_v44 = vmul.f32 %v2320_v41, %v794_v42 }
 0x156   : > { %v2717_v45 = vpop.eup %2716 }
 0x157   : > { %v2719_v46 = vpop.eup %2718  ;;  %v814_v47 = vadd.f32 %v2321_v43, %v804_v44  ;;  %v795_v48 = vmul.f32 %v2717_v45, %v763_v20 }
 0x158   : > { %v796_v49 = vmul.f32 %v2719_v46, %v764_v13 }
 0x159   : > { %818 = vst.msk [vmem:[#allocation2] sm:$0xff] %vm744_vm0, %v814_v47  ;;  %v805_v50 = vmul.f32 %v2320_v41, %v795_v48 }
 0x15a   : > { %v2721_v51 = vpop.eup %2720  ;;  %v806_v52 = vmul.f32 %v2320_v41, %v796_v49 }
 0x15b   : > { %v815_v53 = vadd.f32 %v2321_v43, %v805_v50  ;;  %v797_v54 = vmul.f32 %v2721_v51, %v765_v21 }
 0x15c   : > { %v816_v55 = vadd.f32 %v2321_v43, %v806_v52 }
 0x15d   : > { %819 = vst.msk [vmem:[#allocation2 + $0x8] sm:$0xff] %vm744_vm0, %v815_v53  ;;  %v807_v56 = vmul.f32 %v2320_v41, %v797_v54 }
 0x15e   : > { %820 = vst.msk [vmem:[#allocation2 + $0x10] sm:$0xff] %vm744_vm0, %v816_v55 }
 0x15f   : > { %v817_v57 = vadd.f32 %v2321_v43, %v807_v56 }
 0x161   : > { %821 = vst.msk [vmem:[#allocation2 + $0x18] sm:$0xff] %vm744_vm0, %v817_v57 }
 0x162 PF: > { %v826_v58 = vld [vmem:[%s2984_s22] sm:$0xff]  ;;  %v827_v59 = vld [vmem:[%s2984_s22 + $0x8] sm:$0xff]  ;;  %v828_v60 = vld [vmem:[%s2984_s22 + $0x10] sm:$0xff]  ;;  %vm837_vm1 = vcmask 261120   ;;  %s3408_s17 = scalar_lea.vmem %s3374_s5, %s2974_s29  ;;  %vm951_vm2 = vcmask 130048   ;;  %s2856_s18 = smov 96  }
 0x163   : > { %v2597_v61 = vpack.c.bf16 %v827_v59, %v826_v58  ;;  %v829_v62 = vld [vmem:[%s2984_s22 + $0x18] sm:$0xff]  ;;  %v3065_v63 = vld [vmem:[#allocation2] sm:$0xff]  ;;  %vm3101_vm3 = vmpackc.low %vm951_vm2, %vm951_vm2  ;;  %s3411_s30 = sld [smem:[#allocation8_spill]]  ;;  %s2859_s1 = smov 112   ;;  %vm1858_vm4 = vcmask 523264  }
 0x164   : > { %v2601_v0 = vpack.c.bf16 %v829_v62, %v828_v60  ;;  %2466 = vmatprep.mubr.msk.f32.mxu0 %vm837_vm1, %v3065_v63  ;;  %v3069_v1 = vld [vmem:[#allocation2 + $0x8] sm:$0xff]  ;;  %v2322_v4 = vld [vmem:[%s3408_s17] ss:$0 sm:$0xff]  ;;  %s2857_s17 = smov 64   ;;  %s2860_s19 = smov 48  }
 0x165   : > { %2598 = vmatprep.subr.bf16.mxu0 %v2597_v61  ;;  %v3071_v2 = vld [vmem:[#allocation2 + $0x10] sm:$0xff]  ;;  %s3412_s21 = sld [smem:[#allocation7_spill]]  ;;  %s2861_s2 = smov 16  }
 0x166   : > { %2600 = vmatpush3.bf16.msra.mxu0 %v2597_v61  ;;  %s3413_s22 = scalar_lea.vmem %s3376_s7, %s2974_s29  ;;  %p2370_p5 = scmp.ne.s32.totalorder %s2968_s28, 1 }
 0x167   : > { %2602 = vmatprep.subr.bf16.mxu0 %v2601_v0  ;;  %vm2051_vm5 = vcmask (!%p2370_p5), 1040384   ;;  %vm2053_vm6 = vcmask (!%p2370_p5), 1041408   ;;  %vm2055_vm7 = vcmask (!%p2370_p5), 1042432   ;;  %vm2863_vm8 = vmmov (!%p2370_p5), 0   ;;  %s3417_s26 = sld [smem:[#allocation14_spill]] (!%p2370_p5) }
 0x168   : > { %v3077_v3 = vld [vmem:[#allocation2 + $0x18] sm:$0xff]  ;;  %vm2151_vm9 = vcmask (!%p2370_p5), 41984  }
 0x169   : > { %v3121_v25 = vld [vmem:[%s3411_s30 + $0x8] sm:$0xff]  ;;  %v3126_v29 = vld [vmem:[%s3411_s30] sm:$0xff]  ;;  %v3134_v36 = vld [vmem:[%s3411_s30 + $0x10] sm:$0xff] }
 0x16a   : > { %2604 = vmatpush3.bf16.msra.mxu0 %v2601_v0  ;;  %v3139_v38 = vld [vmem:[%s3411_s30 + $0x18] sm:$0xff] }
 0x16d   : > { %2467 = vmatmul.mubr.msk.f32.vlgmr.msra.gmra.mrb[0].mxu0 %vm837_vm1, %v3069_v1 }
 0x16e   : > { %2469 = vmatprep.mubr.msk.f32.mxu0 %vm837_vm1, %v3071_v2 }
 0x171   : > { %2470 = vmatmul.mubr.msk.f32.gmra.mrb[2].mxu0 %vm837_vm1, %v3077_v3 }
 0x240   : > { %v2468_v5 = vpop.f32.mrb[0].mxu0 }
 0x241   : > { %v3086_v6 = vadd.f32 %v2468_v5, %v2322_v4  ;;  %v916_v7 = vpop.f32.mrb[1].mxu0 }
 0x242   : > { %v917_v8 = vadd.f32 %v2322_v4, %v916_v7 }
 0x244   : > { %2480 = vmatprep.mubr.msk.f32.mxu1 %vm951_vm2, %v917_v8  ;;  %v3090_v9 = vpack.i.bf16 %v3086_v6, %v917_v8  ;;  %v2471_v10 = vpop.f32.mrb[2].mxu0 }
 0x245   : > { %v3092_v11 = vadd.f32 %v2471_v10, %v2322_v4  ;;  %v926_v12 = vpop.f32.mrb[3].mxu0 }
 0x246   : > { %2723 = vrot.lane.b32.xlu0 %v3090_v9, %s2856_s18  ;;  %v927_v13 = vadd.f32 %v2322_v4, %v926_v12 }
 0x248   : > { %v3096_v14 = vpack.i.bf16 %v3092_v11, %v927_v13 }
 0x24a   : > { %2728 = vrot.lane.b32.xlu0 %v3096_v14, %s2856_s18  ;;  %s2858_s18 = smov 80  }
 0x2b8   : > { %v2724_v15 = vpop.permute.xlu0 %2723 }
 0x2b9   : > { %v2726_v16 = vunpack.i.h.bf16 %v2724_v15  ;;  %v2725_v17 = vunpack.i.l.bf16 %v2724_v15 }
 0x2bb   : > { %v2605_v19 = vpack.c.bf16 %v2726_v16, %v2725_v17 }
 0x2bc   : > { %v2729_v20 = vpop.permute.xlu0 %2728 }
 0x2bd   : > { %2607 = vmatprep.subr.msk.bf16.mxu1 %vm3101_vm3, %v2605_v19  ;;  %v2731_v21 = vunpack.i.h.bf16 %v2729_v20  ;;  %v2730_v22 = vunpack.i.l.bf16 %v2729_v20 }
 0x2be   : > { %2610 = vmatpush3.bf16.xpose.msk.msra.mxu1 %vm3101_vm3, %v2605_v19 }
 0x2bf   : > { %v2611_v23 = vpack.c.bf16 %v2731_v21, %v2730_v22 }
 0x2c1   : > { %2613 = vmatprep.subr.msk.bf16.mxu1 %vm3101_vm3, %v2611_v23 }
 0x2c6   : > { %2616 = vmatpush3.bf16.xpose.msk.msra.mxu1 %vm3101_vm3, %v2611_v23 }
 0x2cd   : > { %2481 = vmatmul.mubr.msk.f32.vlgmr.msra.gmra.mrb[0].mxu1 %vm951_vm2, %v3086_v6 }
 0x2ce   : > { %2483 = vmatprep.mubr.msk.f32.mxu1 %vm951_vm2, %v927_v13 }
 0x2d1   : > { %2484 = vmatmul.mubr.msk.f32.gmra.mrb[2].mxu1 %vm951_vm2, %v3092_v11 }
 0x3a0   : > { %v2482_v24 = vpop.f32.mrb[0].mxu1 }
 0x3a1   : > { %v1054_v26 = vmul.f32 0.25, %v2482_v24  ;;  %v1034_v27 = vpop.f32.mrb[1].mxu1 }
 0x3a2   : > { %v1053_v28 = vmul.f32 0.25, %v1034_v27 }
 0x3a3   : > { %v1058_v30 = vadd.f32 %v1054_v26, %v3121_v25 }
 0x3a4   : > { %v2485_v31 = vpop.f32.mrb[2].mxu1  ;;  %v1057_v35 = vadd.f32 %v1053_v28, %v3126_v29 }
 0x3a5   : > { %v1056_v32 = vmul.f32 0.25, %v2485_v31  ;;  %v1044_v33 = vpop.f32.mrb[3].mxu1  ;;  %v1064_v34 = vsel %vm837_vm1, %v1058_v30, -inf }
 0x3a6   : > { %v1055_v37 = vmul.f32 0.25, %v1044_v33  ;;  %1065 = vmax.xlane.f32.xlu1 %v1064_v34  ;;  %v1061_v40 = vsel %vm837_vm1, %v1057_v35, -inf }
 0x3a7   : > { %v1060_v41 = vadd.f32 %v1056_v32, %v3139_v38 }
 0x3a8   : > { %v1059_v39 = vadd.f32 %v1055_v37, %v3134_v36 }
 0x3a9   : > { %v1070_v43 = vsel %vm837_vm1, %v1060_v41, -inf }
 0x3aa   : > { %1062 = vmax.xlane.f32.xlu1 %v1061_v40  ;;  %v1067_v42 = vsel %vm837_vm1, %v1059_v39, -inf }
 0x3ab   : > { %1068 = vmax.xlane.f32.xlu0 %v1067_v42 }
 0x3ae   : > { %1071 = vmax.xlane.f32.xlu1 %v1070_v43 }
 0x3bf   : > { %2733 = vrot.lane.b32.xlu1 %v3090_v9, %s2857_s17 }
 0x3c1   : > { %2738 = vrot.lane.b32.xlu0 %v3096_v14, %s2857_s17  ;;  %s3414_s17 = scalar_lea.vmem %s3377_s8, %s2974_s29 }
 0x3c3   : > { %2743 = vrot.lane.b32.xlu1 %v3090_v9, %s2858_s18 }
 0x3c5   : > { %1218 = vrot.lane.b32.xlu0 %v927_v13, %s2859_s1 }
 0x3c7   : > { %2748 = vrot.lane.b32.xlu1 %v3096_v14, %s2858_s18 }
 0x3cb   : > { %1214 = vrot.lane.b32.xlu1 %v917_v8, %s2859_s1 }
 0x433   : > { %v1066_v44 = vpop.xlane.xlu1 %1065 }
 0x434   : > { %v1074_v45 = vsub.f32 %v1058_v30, %v1066_v44 }
 0x436   : > { %v1079_v46 = vmul.f32 1.442695, %v1074_v45 }
 0x437   : > { %v1063_v47 = vpop.xlane.xlu1 %1062 }
 0x438   : > { %2762 = vpow2.f32 %v1079_v46  ;;  %v1073_v48 = vsub.f32 %v1057_v35, %v1063_v47  ;;  %v1069_v49 = vpop.xlane.xlu0 %1068 }
 0x439   : > { %v1075_v12 = vsub.f32 %v1059_v39, %v1069_v49 }
 0x43a   : > { %v1077_v50 = vmul.f32 1.442695, %v1073_v48 }
 0x43b   : > { %v1072_v51 = vpop.xlane.xlu1 %1071  ;;  %v1081_v15 = vmul.f32 1.442695, %v1075_v12 }
 0x43c   : > { %2764 = vpow2.f32 %v1077_v50  ;;  %v2739_v52 = vpop.permute.xlu0 %2738  ;;  %v1076_v10 = vsub.f32 %v1060_v41, %v1072_v51 }
 0x43d   : > { %v2741_v54 = vunpack.i.h.bf16 %v2739_v52  ;;  %v2740_v55 = vunpack.i.l.bf16 %v2739_v52 }
 0x43e   : > { %v1083_v13 = vmul.f32 1.442695, %v1076_v10 }
 0x43f   : > { %v2734_v53 = vpop.permute.xlu1 %2733  ;;  %v2621_v62 = vpack.c.bf16 %v2741_v54, %v2740_v55 }
 0x440   : > { %v2736_v56 = vunpack.i.h.bf16 %v2734_v53  ;;  %v2735_v57 = vunpack.i.l.bf16 %v2734_v53  ;;  %2766 = vpow2.f32 %v1083_v13  ;;  %v1219_v41 = vpop.permute.xlu0 %1218 }
 0x441   : > { %2768 = vpow2.f32 %v1081_v15 }
 0x442   : > { %v2763_v58 = vpop.eup %2762  ;;  %v2617_v59 = vpack.c.bf16 %v2736_v56, %v2735_v57 }
 0x443   : > { %v2744_v60 = vpop.permute.xlu1 %2743  ;;  %v1088_v61 = vsel %vm837_vm1, %v2763_v58, 0.0 }
 0x444   : > { %v2746_v0 = vunpack.i.h.bf16 %v2744_v60  ;;  %v2745_v4 = vunpack.i.l.bf16 %v2744_v60  ;;  %1089 = vadd.xlane.f32.xlu1 %v1088_v61  ;;  %2618 = vmatprep.subr.bf16.mxu0 %v2617_v59 }
 0x445   : > { %2620 = vmatpush3.bf16.msra.mxu0 %v2617_v59 }
 0x446   : > { %v2765_v5 = vpop.eup %2764  ;;  %2622 = vmatprep.subr.bf16.mxu0 %v2621_v62  ;;  %v2625_v8 = vpack.c.bf16 %v2746_v0, %v2745_v4 }
 0x447   : > { %v1085_v7 = vsel %vm837_vm1, %v2765_v5, 0.0  ;;  %v2749_v21 = vpop.permute.xlu1 %2748 }
 0x448   : > { %1086 = vadd.xlane.f32.xlu1 %v1085_v7  ;;  %v2751_v27 = vunpack.i.h.bf16 %v2749_v21  ;;  %v2750_v28 = vunpack.i.l.bf16 %v2749_v21 }
 0x449   : > { %2624 = vmatpush3.bf16.msra.mxu0 %v2621_v62 }
 0x44a   : > { %2627 = vmatprep.subr.msk.bf16.mxu0 %vm3101_vm3, %v2625_v8  ;;  %v2767_v16 = vpop.eup %2766  ;;  %v2631_v32 = vpack.c.bf16 %v2751_v27, %v2750_v28 }
 0x44b   : > { %v1094_v17 = vsel %vm837_vm1, %v2767_v16, 0.0  ;;  %v2769_v19 = vpop.eup %2768  ;;  %v1215_v22 = vpop.permute.xlu1 %1214 }
 0x44c   : > { %v1091_v20 = vsel %vm837_vm1, %v2769_v19, 0.0 }
 0x459   : > { %1216 = vrot.lane.b32.xlu1 %v3086_v6, %s2859_s1 }
 0x47d   : > { %1095 = vadd.xlane.f32.xlu1 %v1094_v17 }
 0x481   : > { %1092 = vadd.xlane.f32.xlu1 %v1091_v20 }
 0x492   : > { %1220 = vrot.lane.b32.xlu1 %v3092_v11, %s2859_s1 }
 0x4d1   : > { %v1090_v6 = vpop.xlane.xlu1 %1089 }
 0x4d2   : > { %2770 = vrcp.f32 %v1090_v6 }
 0x4d5   : > { %v1087_v23 = vpop.xlane.xlu1 %1086 }
 0x4d6   : > { %2772 = vrcp.f32 %v1087_v23 }
 0x4d9   : > { %v1217_v11 = vpop.permute.xlu1 %1216 }
 0x4dc   : > { %v2771_v24 = vpop.eup %2770 }
 0x4dd   : > { %v1102_v31 = vmul.f32 %v2771_v24, %v2763_v58 }
 0x4e0   : > { %v2773_v26 = vpop.eup %2772 }
 0x4e1   : > { %v1101_v30 = vmul.f32 %v2773_v26, %v2765_v5 }
 0x4e3   : > { %2494 = vmatprep.mubr.msk.f32.mxu0 %vm837_vm1, %v1101_v30 }
 0x4e4   : > { %2495 = vmatmul.mubr.msk.f32.vlgmr.msra.gmra.mrb[4].mxu0 %vm837_vm1, %v1102_v31 }
 0x4e5   : > { %2630 = vmatpush3.bf16.xpose.msk.msra.mxu0 %vm3101_vm3, %v2625_v8 }
 0x4e6   : > { %2633 = vmatprep.subr.msk.bf16.mxu0 %vm3101_vm3, %v2631_v32 }
 0x4ed   : > { %2636 = vmatpush3.bf16.xpose.msk.msra.mxu0 %vm3101_vm3, %v2631_v32 }
 0x50a   : > { %v1096_v33 = vpop.xlane.xlu1 %1095 }
 0x50b   : > { %2774 = vrcp.f32 %v1096_v33 }
 0x50e   : > { %v1093_v34 = vpop.xlane.xlu1 %1092 }
 0x50f   : > { %2776 = vrcp.f32 %v1093_v34 }
 0x512   : > { %v1221_v18 = vpop.permute.xlu1 %1220 }
 0x515   : > { %v2775_v35 = vpop.eup %2774 }
 0x516   : > { %v1104_v40 = vmul.f32 %v2775_v35, %v2767_v16 }
 0x519   : > { %v2777_v37 = vpop.eup %2776 }
 0x51a   : > { %v1103_v39 = vmul.f32 %v2777_v37, %v2769_v19 }
 0x51c   : > { %2497 = vmatprep.mubr.msk.f32.mxu0 %vm837_vm1, %v1103_v39 }
 0x51d   : > { %2498 = vmatmul.mubr.msk.f32.gmra.mrb[6].mxu0 %vm837_vm1, %v1104_v40 }
 0x51e   : > { %2508 = vmatprep.mubr.msk.f32.mxu0 %vm951_vm2, %v1215_v22 }
 0x521   : > { %2509 = vmatmul.mubr.msk.f32.vlgmr.msra.gmra.mrb[8].mxu0 %vm951_vm2, %v1217_v11 }
 0x522   : > { %2511 = vmatprep.mubr.msk.f32.mxu0 %vm951_vm2, %v1219_v41 }
 0x525   : > { %2512 = vmatmul.mubr.msk.f32.gmra.mrb[10].mxu0 %vm951_vm2, %v1221_v18 }
 0x5b7   : > { %v3176_v42 = vpop.f32.mrb[4].mxu0 }
 0x5b8   : > { %v3178_v43 = vpop.f32.mrb[5].mxu0 }
 0x5f0   : > { %v3180_v44 = vpop.f32.mrb[6].mxu0 }
 0x5f1   : > { %v3182_v45 = vpop.f32.mrb[7].mxu0 }
 0x5f4   : > { %v2510_v46 = vpop.f32.mrb[8].mxu0 }
 0x5f5   : > { %v1332_v47 = vmul.f32 0.25, %v2510_v46  ;;  %v1312_v48 = vpop.f32.mrb[9].mxu0  ;;  %v1512_v46 = vld [vmem:[%s3412_s21] sm:$0xff] }
 0x5f6   : > { %v1331_v49 = vmul.f32 0.25, %v1312_v48 }
 0x5f7   : > { %v1336_v50 = vadd.f32 %v1332_v47, %v3121_v25  ;;  %v1513_v47 = vld [vmem:[%s3412_s21 + $0x8] sm:$0xff] }
 0x5f8   : > { %v2513_v51 = vpop.f32.mrb[10].mxu0  ;;  %v1335_v52 = vadd.f32 %v1331_v49, %v3126_v29  ;;  %v2645_v48 = vpack.c.bf16 %v1513_v47, %v1512_v46  ;;  %v1514_v49 = vld [vmem:[%s3412_s21 + $0x10] sm:$0xff] }
 0x5f9   : > { %v1322_v53 = vpop.f32.mrb[11].mxu0  ;;  %v1342_v54 = vsel %vm837_vm1, %v1336_v50, -inf  ;;  %v1334_v55 = vmul.f32 0.25, %v2513_v51 }
 0x5fa   : > { %v1333_v56 = vmul.f32 0.25, %v1322_v53  ;;  %1343 = vmax.xlane.f32.xlu1 %v1342_v54  ;;  %v1339_v57 = vsel %vm837_vm1, %v1335_v52, -inf }
 0x5fb   : > { %1340 = vmax.xlane.f32.xlu0 %v1339_v57  ;;  %v1338_v60 = vadd.f32 %v1334_v55, %v3139_v38 }
 0x5fc   : > { %v1337_v58 = vadd.f32 %v1333_v56, %v3134_v36 }
 0x5fd   : > { %v1348_v25 = vsel %vm837_vm1, %v1338_v60, -inf }
 0x5fe   : > { %v1345_v59 = vsel %vm837_vm1, %v1337_v58, -inf }
 0x5ff   : > { %1346 = vmax.xlane.f32.xlu0 %v1345_v59 }
 0x603   : > { %1349 = vmax.xlane.f32.xlu0 %v1348_v25 }
 0x687   : > { %v1344_v29 = vpop.xlane.xlu1 %1343 }
 0x688   : > { %v1352_v61 = vsub.f32 %v1336_v50, %v1344_v29  ;;  %v1341_v62 = vpop.xlane.xlu0 %1340  ;;  %v1515_v50 = vld [vmem:[%s3412_s21 + $0x18] sm:$0xff] }
 0x689   : > { %v1351_v0 = vsub.f32 %v1335_v52, %v1341_v62  ;;  %v2649_v51 = vpack.c.bf16 %v1515_v50, %v1514_v49 }
 0x68a   : > { %v1357_v4 = vmul.f32 1.442695, %v1352_v61 }
 0x68b   : > { %v1355_v5 = vmul.f32 1.442695, %v1351_v0 }
 0x68c   : > { %2778 = vpow2.f32 %v1357_v4  ;;  %v1347_v7 = vpop.xlane.xlu0 %1346 }
 0x68d   : > { %2780 = vpow2.f32 %v1355_v5  ;;  %v1353_v8 = vsub.f32 %v1337_v58, %v1347_v7 }
 0x68f   : > { %v1359_v10 = vmul.f32 1.442695, %v1353_v8 }
 0x690   : > { %v1350_v36 = vpop.xlane.xlu0 %1349 }
 0x691   : > { %2782 = vpow2.f32 %v1359_v10  ;;  %v1354_v12 = vsub.f32 %v1338_v60, %v1350_v36 }
 0x693   : > { %v1361_v13 = vmul.f32 1.442695, %v1354_v12 }
 0x695   : > { %2784 = vpow2.f32 %v1361_v13 }
 0x696   : > { %v2779_v38 = vpop.eup %2778 }
 0x697   : > { %v2781_v15 = vpop.eup %2780  ;;  %v1366_v16 = vsel %vm837_vm1, %v2779_v38, 0.0 }
 0x698   : > { %1367 = vadd.xlane.f32.xlu0 %v1366_v16  ;;  %v1363_v17 = vsel %vm837_vm1, %v2781_v15, 0.0 }
 0x699   : > { %1364 = vadd.xlane.f32.xlu1 %v1363_v17 }
 0x69b   : > { %v2783_v19 = vpop.eup %2782 }
 0x69c   : > { %v1369_v20 = vsel %vm837_vm1, %v2783_v19, 0.0 }
 0x69d   : > { %1370 = vadd.xlane.f32.xlu1 %v1369_v20 }
 0x69f   : > { %v2785_v21 = vpop.eup %2784 }
 0x6a0   : > { %v1372_v22 = vsel %vm837_vm1, %v2785_v21, 0.0 }
 0x6a1   : > { %1373 = vadd.xlane.f32.xlu0 %v1372_v22 }
 0x6ae   : > { %2753 = vrot.lane.b32.xlu1 %v3090_v9, %s2860_s19 }
 0x6b7   : > { %2758 = vrot.lane.b32.xlu0 %v3096_v14, %s2860_s19  ;;  %s3415_s19 = scalar_lea.vmem %s3378_s9, %s2974_s29 }
 0x725   : > { %v1368_v23 = vpop.xlane.xlu0 %1367 }
 0x726   : > { %v1365_v6 = vpop.xlane.xlu1 %1364 }
 0x727   : > { %2786 = vrcp.f32 %v1365_v6 }
 0x728   : > { %2788 = vrcp.f32 %v1368_v23 }
 0x72a   : > { %v1371_v24 = vpop.xlane.xlu1 %1370 }
 0x72b   : > { %2790 = vrcp.f32 %v1371_v24 }
 0x72e   : > { %v2754_v26 = vpop.permute.xlu1 %2753  ;;  %v1374_v27 = vpop.xlane.xlu0 %1373 }
 0x72f   : > { %v2756_v28 = vunpack.i.h.bf16 %v2754_v26  ;;  %v2755_v30 = vunpack.i.l.bf16 %v2754_v26  ;;  %2792 = vrcp.f32 %v1374_v27 }
 0x731   : > { %v2787_v31 = vpop.eup %2786  ;;  %v2637_v32 = vpack.c.bf16 %v2756_v28, %v2755_v30 }
 0x732   : > { %v2759_v11 = vpop.permute.xlu0 %2758  ;;  %v1379_v33 = vmul.f32 %v2787_v31, %v2781_v15  ;;  %v2789_v14 = vpop.eup %2788 }
 0x733   : > { %v2761_v34 = vunpack.i.h.bf16 %v2759_v11  ;;  %v2760_v35 = vunpack.i.l.bf16 %v2759_v11  ;;  %2638 = vmatprep.subr.bf16.mxu1 %v2637_v32  ;;  %v1380_v39 = vmul.f32 %v2789_v14, %v2779_v38  ;;  %v1701_v14 = vld [vmem:[%s3006_s4 + $0x10] sm:$0xff] }
 0x734   : > { %2640 = vmatpush3.bf16.msra.mxu1 %v2637_v32  ;;  %2522 = vmatprep.mubr.msk.f32.mxu1 %vm837_vm1, %v1379_v33 }
 0x735   : > { %v2641_v9 = vpack.c.bf16 %v2761_v34, %v2760_v35  ;;  %v2791_v37 = vpop.eup %2790  ;;  %v1699_v34 = vld [vmem:[%s3006_s4] sm:$0xff]  ;;  %v1700_v35 = vld [vmem:[%s3006_s4 + $0x8] sm:$0xff] }
 0x736   : > { %v1381_v41 = vmul.f32 %v2791_v37, %v2783_v19  ;;  %v1702_v37 = vld [vmem:[%s3006_s4 + $0x18] sm:$0xff] }
 0x737   : > { %2642 = vmatprep.subr.bf16.mxu1 %v2641_v9 }
 0x738   : > { %2644 = vmatpush3.bf16.msra.mxu1 %v2641_v9  ;;  %v2653_v9 = vpack.c.bf16 %v1700_v35, %v1699_v34 }
 0x739   : > { %v2793_v40 = vpop.eup %2792  ;;  %2646 = vmatprep.subr.bf16.mxu1 %v2645_v48 }
 0x73a   : > { %v1382_v18 = vmul.f32 %v2793_v40, %v2785_v21  ;;  %2654 = vmatprep.subr.bf16.mxu0 %v2653_v9 }
 0x73b   : > { %2523 = vmatmul.mubr.msk.f32.vlgmr.msra.gmra.mrb[4].mxu1 %vm837_vm1, %v1380_v39  ;;  %v2657_v39 = vpack.c.bf16 %v1702_v37, %v1701_v14  ;;  %2656 = vmatpush3.bf16.msra.mxu0 %v2653_v9 }
 0x73c   : > { %2525 = vmatprep.mubr.msk.f32.mxu1 %vm837_vm1, %v1381_v41  ;;  %2648 = vmatpush3.bf16.msra.mxu1 %v2645_v48 }
 0x73d   : > { %2650 = vmatprep.subr.bf16.mxu1 %v2649_v51  ;;  %2658 = vmatprep.subr.bf16.mxu0 %v2657_v39 }
 0x73f   : > { %2526 = vmatmul.mubr.msk.f32.gmra.mrb[6].mxu1 %vm837_vm1, %v1382_v18  ;;  %2660 = vmatpush3.bf16.msra.mxu0 %v2657_v39 }
 0x740   : > { %2652 = vmatpush3.bf16.msra.mxu1 %v2649_v51 }
 0x80e   : > { %v2524_v52 = vpop.f32.mrb[4].mxu1 }
 0x80f   : > { %v1473_v53 = vpop.f32.mrb[5].mxu1 }
 0x810   : > { %1496 = vrot.lane.b32.xlu1 %v1473_v53, %s2861_s2 }
 0x812   : > { %v2527_v54 = vpop.f32.mrb[6].mxu1 }
 0x813   : > { %v1483_v55 = vpop.f32.mrb[7].mxu1 }
 0x814   : > { %1498 = vrot.lane.b32.xlu1 %v2524_v52, %s2861_s2  ;;  %1500 = vrot.lane.b32.xlu0 %v1483_v55, %s2861_s2 }
 0x818   : > { %1502 = vrot.lane.b32.xlu1 %v2527_v54, %s2861_s2 }
 0x882   : > { %v1497_v56 = vpop.permute.xlu1 %1496 }
 0x883   : > { %v1508_v57 = vsel %vm951_vm2, %v3178_v43, %v1497_v56  ;;  %v2351_v43 = vld [vmem:[%s3413_s22] ss:$0 sm:$0xff] }
 0x884   : > { %2536 = vmatprep.mubr.msk.f32.mxu1 %vm837_vm1, %v1508_v57  ;;  %v2356_v56 = vld [vmem:[%s3414_s17] ss:$0 sm:$0xff] }
 0x886   : > { %v1499_v58 = vpop.permute.xlu1 %1498  ;;  %v1501_v59 = vpop.permute.xlu0 %1500 }
 0x887   : > { %v1509_v60 = vsel %vm951_vm2, %v3176_v42, %v1499_v58  ;;  %v1510_v25 = vsel %vm951_vm2, %v3182_v45, %v1501_v59 }
 0x888   : > { %2537 = vmatmul.mubr.msk.f32.vlgmr.msra.gmra.mrb[8].mxu1 %vm837_vm1, %v1509_v60  ;;  %v2357_v60 = vld [vmem:[%s3415_s19] ss:$0 sm:$0xff] }
 0x889   : > { %2539 = vmatprep.mubr.msk.f32.mxu1 %vm837_vm1, %v1510_v25 }
 0x88a   : > { %v1503_v29 = vpop.permute.xlu1 %1502 }
 0x88b   : > { %v1511_v61 = vsel %vm951_vm2, %v3180_v44, %v1503_v29 }
 0x88c   : > { %2540 = vmatmul.mubr.msk.f32.gmra.mrb[10].mxu1 %vm837_vm1, %v1511_v61 }
 0x95b   : > { %v2538_v62 = vpop.f32.mrb[8].mxu1 }
 0x95c   : > { %v1607_v42 = vadd.f32 %v2538_v62, %v2351_v43  ;;  %v1601_v0 = vpop.f32.mrb[9].mxu1 }
 0x95d   : > { %v1602_v4 = vadd.f32 %v2351_v43, %v1601_v0 }
 0x95e   : > { %v1621_v45 = vadd.f32 %v1607_v42, %v3069_v1 }
 0x95f   : > { %v2541_v5 = vpop.f32.mrb[10].mxu1  ;;  %v1620_v7 = vadd.f32 %v1602_v4, %v3065_v63 }
 0x960   : > { %v1611_v8 = vpop.f32.mrb[11].mxu1  ;;  %v1629_v10 = vsel %vm837_vm1, %v1621_v45, 0.0  ;;  %v1617_v44 = vadd.f32 %v2541_v5, %v2351_v43 }
 0x961   : > { %v1612_v36 = vadd.f32 %v2351_v43, %v1611_v8  ;;  %1630 = vadd.xlane.f32.xlu1 %v1629_v10  ;;  %v1626_v12 = vsel %vm837_vm1, %v1620_v7, 0.0  ;;  %v1843_v10 = vld [vmem:[%s3016_s27] sm:$0xff] }
 0x962   : > { %1627 = vadd.xlane.f32.xlu0 %v1626_v12  ;;  %v1623_v15 = vadd.f32 %v1617_v44, %v3077_v3  ;;  %v1844_v44 = vld [vmem:[%s3016_s27 + $0x8] sm:$0xff]  ;;  %v1845_v12 = vld [vmem:[%s3016_s27 + $0x10] sm:$0xff] }
 0x963   : > { %v1622_v13 = vadd.f32 %v1612_v36, %v3071_v2  ;;  %v2661_v36 = vpack.c.bf16 %v1844_v44, %v1843_v10 }
 0x964   : > { %v1635_v1 = vsel %vm837_vm1, %v1623_v15, 0.0 }
 0x965   : > { %v1632_v38 = vsel %vm837_vm1, %v1622_v13, 0.0  ;;  %2662 = vmatprep.subr.bf16.mxu1 %v2661_v36 }
 0x966   : > { %1633 = vadd.xlane.f32.xlu0 %v1632_v38  ;;  %2664 = vmatpush3.bf16.msra.mxu1 %v2661_v36 }
 0x96a   : > { %1636 = vadd.xlane.f32.xlu0 %v1635_v1  ;;  %v1848_v1 = vld [vmem:[%s3016_s27 + $0x28] sm:$0xff] }
 0x9ee   : > { %v1631_v63 = vpop.xlane.xlu1 %1630 }
 0x9ef   : > { %v1640_v16 = vmul.f32 0.03125, %v1631_v63  ;;  %v1628_v17 = vpop.xlane.xlu0 %1627 }
 0x9f0   : > { %v1639_v19 = vmul.f32 0.03125, %v1628_v17  ;;  %v1850_v17 = vld [vmem:[%s3016_s27 + $0x38] sm:$0xff] }
 0x9f1   : > { %v1644_v20 = vsub.f32 %v1621_v45, %v1640_v16  ;;  %v1849_v16 = vld [vmem:[%s3016_s27 + $0x30] sm:$0xff] }
 0x9f2   : > { %v1643_v21 = vsub.f32 %v1620_v7, %v1639_v19  ;;  %v2673_v19 = vpack.c.bf16 %v1850_v17, %v1849_v16 }
 0x9f3   : > { %v1634_v22 = vpop.xlane.xlu0 %1633  ;;  %v1648_v6 = vmul.f32 %v1644_v20, %v1644_v20 }
 0x9f4   : > { %v1641_v23 = vmul.f32 0.03125, %v1634_v22  ;;  %v1647_v24 = vmul.f32 %v1643_v21, %v1643_v21 }
 0x9f5   : > { %v1654_v2 = vsel %vm837_vm1, %v1648_v6, 0.0 }
 0x9f6   : > { %v1645_v26 = vsub.f32 %v1622_v13, %v1641_v23  ;;  %1655 = vadd.xlane.f32.xlu0 %v1654_v2  ;;  %v1651_v3 = vsel %vm837_vm1, %v1647_v24, 0.0  ;;  %v1846_v13 = vld [vmem:[%s3016_s27 + $0x18] sm:$0xff] }
 0x9f7   : > { %1652 = vadd.xlane.f32.xlu1 %v1651_v3  ;;  %v1637_v27 = vpop.xlane.xlu0 %1636  ;;  %v2665_v38 = vpack.c.bf16 %v1846_v13, %v1845_v12 }
 0x9f8   : > { %v1642_v28 = vmul.f32 0.03125, %v1637_v27  ;;  %v1649_v30 = vmul.f32 %v1645_v26, %v1645_v26 }
 0x9f9   : > { %2666 = vmatprep.subr.bf16.mxu1 %v2665_v38 }
 0x9fa   : > { %v1646_v31 = vsub.f32 %v1623_v15, %v1642_v28  ;;  %v1657_v32 = vsel %vm837_vm1, %v1649_v30, 0.0  ;;  %2668 = vmatpush3.bf16.msra.mxu1 %v2665_v38  ;;  %v1847_v15 = vld [vmem:[%s3016_s27 + $0x20] sm:$0xff] }
 0x9fb   : > { %1658 = vadd.xlane.f32.xlu1 %v1657_v32  ;;  %v2669_v63 = vpack.c.bf16 %v1848_v1, %v1847_v15 }
 0x9fc   : > { %v1650_v11 = vmul.f32 %v1646_v31, %v1646_v31 }
 0x9fd   : > { %2670 = vmatprep.subr.bf16.mxu1 %v2669_v63 }
 0x9fe   : > { %v1660_v33 = vsel %vm837_vm1, %v1650_v11, 0.0  ;;  %2672 = vmatpush3.bf16.msra.mxu1 %v2669_v63 }
 0x9ff   : > { %1661 = vadd.xlane.f32.xlu0 %v1660_v33  ;;  %2674 = vmatprep.subr.bf16.mxu1 %v2673_v19 }
 0xa02   : > { %2676 = vmatpush3.bf16.msra.mxu1 %v2673_v19 }
 0xa83   : > { %v1656_v40 = vpop.xlane.xlu0 %1655 }
 0xa84   : > { %v1664_v41 = vmul.f32 0.03125, %v1656_v40  ;;  %v1653_v18 = vpop.xlane.xlu1 %1652 }
 0xa85   : > { %v1663_v46 = vmul.f32 0.03125, %v1653_v18 }
 0xa86   : > { %v1668_v47 = vadd.f32 1e-12, %v1664_v41 }
 0xa87   : > { %v1667_v48 = vadd.f32 1e-12, %v1663_v46 }
 0xa88   : > { %2794 = vrsqrt.f32 %v1668_v47  ;;  %v1659_v49 = vpop.xlane.xlu1 %1658 }
 0xa89   : > { %2796 = vrsqrt.f32 %v1667_v48  ;;  %v1665_v50 = vmul.f32 0.03125, %v1659_v49 }
 0xa8b   : > { %v1669_v51 = vadd.f32 1e-12, %v1665_v50 }
 0xa8c   : > { %v1662_v52 = vpop.xlane.xlu0 %1661 }
 0xa8d   : > { %2798 = vrsqrt.f32 %v1669_v51  ;;  %v1666_v53 = vmul.f32 0.03125, %v1662_v52 }
 0xa8f   : > { %v1670_v54 = vadd.f32 1e-12, %v1666_v53 }
 0xa91   : > { %2800 = vrsqrt.f32 %v1670_v54 }
 0xa92   : > { %v2795_v55 = vpop.eup %2794 }
 0xa93   : > { %v2797_v57 = vpop.eup %2796  ;;  %v1676_v58 = vmul.f32 %v2795_v55, %v1644_v20  ;;  %v2358_v20 = vld [vmem:[%s719_s6] ss:$0 sm:$0xff] }
 0xa94   : > { %v1675_v59 = vmul.f32 %v2797_v57, %v1643_v21 }
 0xa95   : > { %v1686_v25 = vmul.f32 %v2356_v56, %v1676_v58 }
 0xa96   : > { %v1685_v29 = vmul.f32 %v2356_v56, %v1675_v59 }
 0xa97   : > { %v2799_v61 = vpop.eup %2798  ;;  %v3251_v42 = vadd.f32 %v2357_v60, %v1686_v25 }
 0xa98   : > { %v3249_v43 = vadd.f32 %v2357_v60, %v1685_v29  ;;  %v1677_v62 = vmul.f32 %v2799_v61, %v1645_v26 }
 0xa9a   : > { %2550 = vmatprep.mubr.msk.f32.mxu0 %vm837_vm1, %v3249_v43  ;;  %v1687_v0 = vmul.f32 %v2356_v56, %v1677_v62 }
 0xa9b   : > { %v2801_v4 = vpop.eup %2800  ;;  %2551 = vmatmul.mubr.msk.f32.vlgmr.msra.gmra.mrb[12].mxu0 %vm837_vm1, %v3251_v42 }
 0xa9c   : > { %v3257_v45 = vadd.f32 %v2357_v60, %v1687_v0  ;;  %v1678_v5 = vmul.f32 %v2801_v4, %v1646_v31  ;;  %v2363_v4 = vld [vmem:[%s727_s0] ss:$0 sm:$0xff]  ;;  %s2865_s0 = smov (!%p2370_p5), 32  }
 0xa9e   : > { %2553 = vmatprep.mubr.msk.f32.mxu0 %vm837_vm1, %v3257_v45  ;;  %v1688_v7 = vmul.f32 %v2356_v56, %v1678_v5 }
 0xaa0   : > { %v3261_v8 = vadd.f32 %v2357_v60, %v1688_v7 }
 0xaa2   : > { %2554 = vmatmul.mubr.msk.f32.gmra.mrb[14].mxu0 %vm837_vm1, %v3261_v8 }
 0xb6e   : > { %v2552_v21 = vpop.f32.mrb[12].mxu0 }
 0xb6f   : > { %v1794_v22 = vadd.f32 %v2552_v21, %v2358_v20  ;;  %v1788_v6 = vpop.f32.mrb[13].mxu0 }
 0xb70   : > { %v1789_v23 = vadd.f32 %v2358_v20, %v1788_v6 }
 0xb71   : > { %v1812_v24 = vmul.f32 0.044715, %v1794_v22  ;;  %v1808_v55 = vmul.f32 0.5, %v1794_v22 }
 0xb72   : > { %v1811_v2 = vmul.f32 0.044715, %v1789_v23  ;;  %v1807_v53 = vmul.f32 0.5, %v1789_v23 }
 0xb73   : > { %v1816_v26 = vmul.f32 %v1812_v24, %v1794_v22 }
 0xb74   : > { %v1815_v3 = vmul.f32 %v1811_v2, %v1789_v23 }
 0xb75   : > { %v1820_v27 = vmul.f32 %v1816_v26, %v1794_v22  ;;  %v2555_v28 = vpop.f32.mrb[14].mxu0 }
 0xb76   : > { %v1819_v30 = vmul.f32 %v1815_v3, %v1789_v23  ;;  %v1804_v31 = vadd.f32 %v2555_v28, %v2358_v20  ;;  %v1798_v32 = vpop.f32.mrb[15].mxu0 }
 0xb77   : > { %v1824_v11 = vadd.f32 %v1820_v27, %v1794_v22  ;;  %v1799_v33 = vadd.f32 %v2358_v20, %v1798_v32 }
 0xb78   : > { %v1823_v34 = vadd.f32 %v1819_v30, %v1789_v23  ;;  %v1814_v35 = vmul.f32 0.044715, %v1804_v31  ;;  %v1810_v61 = vmul.f32 0.5, %v1804_v31 }
 0xb79   : > { %v1828_v9 = vmul.f32 0.7978846, %v1824_v11  ;;  %v1813_v14 = vmul.f32 0.044715, %v1799_v33  ;;  %v1809_v25 = vmul.f32 0.5, %v1799_v33 }
 0xb7a   : > { %v1818_v37 = vmul.f32 %v1814_v35, %v1804_v31  ;;  %v1827_v39 = vmul.f32 0.7978846, %v1823_v34 }
 0xb7b   : > { %2802 = vtanh.f32 %v1828_v9  ;;  %v1817_v40 = vmul.f32 %v1813_v14, %v1799_v33 }
 0xb7c   : > { %v1822_v41 = vmul.f32 %v1818_v37, %v1804_v31  ;;  %2804 = vtanh.f32 %v1827_v39 }
 0xb7d   : > { %v1821_v18 = vmul.f32 %v1817_v40, %v1799_v33 }
 0xb7e   : > { %v1826_v46 = vadd.f32 %v1822_v41, %v1804_v31 }
 0xb7f   : > { %v1825_v47 = vadd.f32 %v1821_v18, %v1799_v33 }
 0xb80   : > { %v1830_v48 = vmul.f32 0.7978846, %v1826_v46 }
 0xb81   : > { %v1829_v49 = vmul.f32 0.7978846, %v1825_v47 }
 0xb82   : > { %2806 = vtanh.f32 %v1830_v48 }
 0xb83   : > { %2808 = vtanh.f32 %v1829_v49 }
 0xb85   : > { %v2803_v50 = vpop.eup %2802 }
 0xb86   : > { %v2805_v51 = vpop.eup %2804  ;;  %v1836_v52 = vadd.f32 1.0, %v2803_v50 }
 0xb87   : > { %v1835_v54 = vadd.f32 1.0, %v2805_v51 }
 0xb88   : > { %v1840_v57 = vmul.f32 %v1836_v52, %v1808_v55  ;;  %v2368_v52 = vld [vmem:[%s730_s20] ss:$0 sm:$0xff]  ;;  %s3416_s20 = sld [smem:[#allocation13_spill]] (!%p2370_p5) }
 0xb89   : > { %v1839_v56 = vmul.f32 %v1835_v54, %v1807_v53  ;;  %v2369_v55 = vld [vmem:[%s733_s16] ss:$0 sm:$0xff] }
 0xb8b   : > { %2572 = vmatprep.mubr.msk.f32.mxu1 %vm1858_vm4, %v1839_v56 }
 0xb8c   : > { %v2807_v58 = vpop.eup %2806  ;;  %2573 = vmatmul.mubr.msk.f32.vlgmr.msra.gmra.mrb[12].mxu1 %vm1858_vm4, %v1840_v57 }
 0xb8d   : > { %v2809_v59 = vpop.eup %2808  ;;  %v1838_v60 = vadd.f32 1.0, %v2807_v58 }
 0xb8e   : > { %v1837_v29 = vadd.f32 1.0, %v2809_v59 }
 0xb8f   : > { %v1842_v0 = vmul.f32 %v1838_v60, %v1810_v61 }
 0xb90   : > { %v1841_v62 = vmul.f32 %v1837_v29, %v1809_v25 }
 0xb92   : > { %2575 = vmatprep.mubr.msk.f32.mxu1 %vm1858_vm4, %v1841_v62 }
 0xb93   : > { %2576 = vmatmul.mubr.msk.f32.gmra.mrb[14].mxu1 %vm1858_vm4, %v1842_v0 }
 0xc5f   : > { %v2574_v5 = vpop.f32.mrb[12].mxu1 }
 0xc60   : > { %v1943_v7 = vadd.f32 %v2574_v5, %v2363_v4  ;;  %v1937_v10 = vpop.f32.mrb[13].mxu1 }
 0xc61   : > { %v1938_v44 = vadd.f32 %v2363_v4, %v1937_v10 }
 0xc62   : > { %v1957_v36 = vadd.f32 %v1943_v7, %v3251_v42 }
 0xc63   : > { %v1956_v12 = vadd.f32 %v1938_v44, %v3249_v43 }
 0xc64   : > { %v1965_v13 = vsel %vm837_vm1, %v1957_v36, 0.0 }
 0xc65   : > { %1966 = vadd.xlane.f32.xlu0 %v1965_v13  ;;  %v1962_v38 = vsel %vm837_vm1, %v1956_v12, 0.0  ;;  %v2064_v13 = vld [vmem:[%s3416_s20 + $0x8] sm:$0xff] (!%p2370_p5) }
 0xc66   : > { %1963 = vadd.xlane.f32.xlu1 %v1962_v38  ;;  %v2577_v15 = vpop.f32.mrb[14].mxu1  ;;  %v2065_v38 = vld [vmem:[%s3416_s20 + $0x10] sm:$0xff] (!%p2370_p5) }
 0xc67   : > { %v1953_v1 = vadd.f32 %v2577_v15, %v2363_v4  ;;  %v1947_v63 = vpop.f32.mrb[15].mxu1  ;;  %v2066_v15 = vld [vmem:[%s3416_s20 + $0x18] sm:$0xff] (!%p2370_p5) }
 0xc68   : > { %v1948_v16 = vadd.f32 %v2363_v4, %v1947_v63  ;;  %v2862_v63 = vmov (!%p2370_p5), 0.0|0.0  }
 0xc69   : > { %v1959_v17 = vadd.f32 %v1953_v1, %v3261_v8  ;;  %2677 = vmatprep.subr.bf16.mxu0 (!%p2370_p5), %v2862_v63 }
 0xc6a   : > { %v1958_v19 = vadd.f32 %v1948_v16, %v3257_v45 }
 0xc6b   : > { %v1971_v20 = vsel %vm837_vm1, %v1959_v17, 0.0 }
 0xc6c   : > { %1972 = vadd.xlane.f32.xlu0 %v1971_v20  ;;  %v1968_v42 = vsel %vm837_vm1, %v1958_v19, 0.0  ;;  %v2681_v20 = vpack.c.bf16 (!%p2370_p5), %v2066_v15, %v2065_v38 }
 0xc6d   : > { %1969 = vadd.xlane.f32.xlu1 %v1968_v42  ;;  %v2864_v42 = vmov (!%p2370_p5), 0.0  }
 0xc6e   : > { %2594 = vmatprep.mubr.msk.f32.mxu0 (!%p2370_p5), %vm2863_vm8, %v2864_v42 }
 0xcf2   : > { %v1967_v43 = vpop.xlane.xlu0 %1966 }
 0xcf3   : > { %v1975_v21 = vmul.f32 0.03125, %v1967_v43  ;;  %v1964_v22 = vpop.xlane.xlu1 %1963 }
 0xcf4   : > { %v1974_v6 = vmul.f32 0.03125, %v1964_v22  ;;  %v2068_v22 = vld [vmem:[%s3416_s20 + $0x28] sm:$0xff] (!%p2370_p5) }
 0xcf5   : > { %v1979_v23 = vsub.f32 %v1957_v36, %v1975_v21  ;;  %v2067_v21 = vld [vmem:[%s3416_s20 + $0x20] sm:$0xff] (!%p2370_p5) }
 0xcf6   : > { %v1978_v24 = vsub.f32 %v1956_v12, %v1974_v6  ;;  %v2063_v12 = vld [vmem:[%s3416_s20] sm:$0xff] (!%p2370_p5)  ;;  %v2684_v6 = vpack.c.bf16 (!%p2370_p5), %v2068_v22, %v2067_v21 }
 0xcf7   : > { %v1983_v2 = vmul.f32 %v1979_v23, %v1979_v23  ;;  %v2678_v16 = vpack.c.bf16 (!%p2370_p5), %v2064_v13, %v2063_v12 }
 0xcf8   : > { %v1982_v26 = vmul.f32 %v1978_v24, %v1978_v24 }
 0xcf9   : > { %v1973_v3 = vpop.xlane.xlu0 %1972  ;;  %v1989_v27 = vsel %vm837_vm1, %v1983_v2, 0.0  ;;  %2679 = vmatpush3.bf16.msra.mxu0 (!%p2370_p5), %v2678_v16 }
 0xcfa   : > { %v1977_v8 = vmul.f32 0.03125, %v1973_v3  ;;  %v1970_v28 = vpop.xlane.xlu1 %1969  ;;  %1990 = vadd.xlane.f32.xlu0 %v1989_v27  ;;  %v1986_v45 = vsel %vm837_vm1, %v1982_v26, 0.0  ;;  %2680 = vmatprep.subr.bf16.mxu0 (!%p2370_p5), %v2862_v63  ;;  %v2371_v27 = vld [vmem:[%s3417_s26] ss:$0 sm:$0xff] (!%p2370_p5) }
 0xcfb   : > { %v1976_v30 = vmul.f32 0.03125, %v1970_v28  ;;  %1987 = vadd.xlane.f32.xlu1 %v1986_v45 }
 0xcfc   : > { %v1981_v31 = vsub.f32 %v1959_v17, %v1977_v8 }
 0xcfd   : > { %v1980_v32 = vsub.f32 %v1958_v19, %v1976_v30  ;;  %2682 = vmatpush3.bf16.msra.mxu0 (!%p2370_p5), %v2681_v20 }
 0xcfe   : > { %v1985_v11 = vmul.f32 %v1981_v31, %v1981_v31  ;;  %2683 = vmatprep.subr.bf16.mxu0 (!%p2370_p5), %v2862_v63 }
 0xcff   : > { %v1984_v33 = vmul.f32 %v1980_v32, %v1980_v32 }
 0xd00   : > { %v1995_v34 = vsel %vm837_vm1, %v1985_v11, 0.0 }
 0xd01   : > { %1996 = vadd.xlane.f32.xlu0 %v1995_v34  ;;  %v1992_v35 = vsel %vm837_vm1, %v1984_v33, 0.0  ;;  %2685 = vmatpush3.bf16.msra.mxu0 (!%p2370_p5), %v2684_v6 }
 0xd02   : > { %1993 = vadd.xlane.f32.xlu1 %v1992_v35  ;;  %2686 = vmatprep.subr.bf16.mxu0 (!%p2370_p5), %v2862_v63 }
 0xd87   : > { %v1991_v9 = vpop.xlane.xlu0 %1990 }
 0xd88   : > { %v1999_v14 = vmul.f32 0.03125, %v1991_v9  ;;  %v1988_v37 = vpop.xlane.xlu1 %1987 }
 0xd89   : > { %v1998_v39 = vmul.f32 0.03125, %v1988_v37 }
 0xd8a   : > { %v2003_v40 = vadd.f32 1e-12, %v1999_v14 }
 0xd8b   : > { %v2002_v41 = vadd.f32 1e-12, %v1998_v39 }
 0xd8c   : > { %2810 = vrsqrt.f32 %v2003_v40 }
 0xd8d   : > { %2812 = vrsqrt.f32 %v2002_v41 }
 0xd8e   : > { %v1997_v18 = vpop.xlane.xlu0 %1996 }
 0xd8f   : > { %v2001_v46 = vmul.f32 0.03125, %v1997_v18  ;;  %v1994_v47 = vpop.xlane.xlu1 %1993 }
 0xd90   : > { %v2000_v48 = vmul.f32 0.03125, %v1994_v47 }
 0xd91   : > { %v2005_v49 = vadd.f32 1e-12, %v2001_v46 }
 0xd92   : > { %v2004_v50 = vadd.f32 1e-12, %v2000_v48 }
 0xd93   : > { %2814 = vrsqrt.f32 %v2005_v49 }
 0xd94   : > { %2816 = vrsqrt.f32 %v2004_v50 }
 0xd96   : > { %v2811_v51 = vpop.eup %2810 }
 0xd97   : > { %v2813_v53 = vpop.eup %2812  ;;  %v2011_v54 = vmul.f32 %v2811_v51, %v1979_v23  ;;  %v2069_v23 = vld [vmem:[%s3416_s20 + $0x30] sm:$0xff] (!%p2370_p5) }
 0xd98   : > { %v2010_v56 = vmul.f32 %v2813_v53, %v1978_v24  ;;  %v2070_v24 = vld [vmem:[%s3416_s20 + $0x38] sm:$0xff] (!%p2370_p5) }
 0xd99   : > { %v2021_v57 = vmul.f32 %v2368_v52, %v2011_v54  ;;  %v2687_v2 = vpack.c.bf16 (!%p2370_p5), %v2070_v24, %v2069_v23 }
 0xd9a   : > { %v2020_v58 = vmul.f32 %v2368_v52, %v2010_v56 }
 0xd9b   : > { %v2031_v59 = vadd.f32 %v2369_v55, %v2021_v57  ;;  %2688 = vmatpush3.bf16.msra.mxu0 (!%p2370_p5), %v2687_v2 }
 0xd9c   : > { %v2030_v60 = vadd.f32 %v2369_v55, %v2020_v58 }
 0xd9d   : > { %v2815_v25 = vpop.eup %2814  ;;  %2035 = vst.msk [vmem:[#allocation2 + $0x8] sm:$0xff] %vm837_vm1, %v2031_v59  ;;  %v2043_v10 = vrot.slane (!%p2370_p5), %v2031_v59, 7 }
 0xd9e   : > { %v2817_v29 = vpop.eup %2816  ;;  %2034 = vst.msk [vmem:[#allocation2] sm:$0xff] %vm837_vm1, %v2030_v60  ;;  %v2013_v61 = vmul.f32 %v2815_v25, %v1981_v31 }
 0xd9f   : > { %v2012_v62 = vmul.f32 %v2817_v29, %v1980_v32  ;;  %2041 = sbr.rel (%p2370_p5) target bundleno = 3830 (0xef6), region = 100  ;;  %v2052_v1 = vsel (!%p2370_p5), %vm2051_vm5, %v2030_v60, %v2043_v10 }
 0xda0   : > { %v2023_v0 = vmul.f32 %v2368_v52, %v2013_v61 }
 0xda1   : > { %v2022_v4 = vmul.f32 %v2368_v52, %v2012_v62 }
 0xda2   : > { %v2033_v5 = vadd.f32 %v2369_v55, %v2023_v0 }
 0xda3   : > { %v2032_v7 = vadd.f32 %v2369_v55, %v2022_v4 }
 0xda4   : > { %2037 = vst.msk [vmem:[#allocation2 + $0x18] sm:$0xff] %vm837_vm1, %v2033_v5  ;;  %v2049_v36 = vrot.slane (!%p2370_p5), %v2033_v5, 5 }
 0xda5   : > { %2036 = vst.msk [vmem:[#allocation2 + $0x10] sm:$0xff] %vm837_vm1, %v2032_v7  ;;  %v2046_v44 = vrot.slane (!%p2370_p5), %v2032_v7, 6 }
 0xda7   : > { %v2054_v17 = vsel %vm2053_vm6, %v2052_v1, %v2046_v44 }
 0xda8   : > { %v2056_v19 = vsel %vm2055_vm7, %v2054_v17, %v2049_v36 }
 0xda9   : > { %v2058_v43 = vrot.slane %v2056_v19, 2 }
 0xdab   : > { %2059 = vrot.lane.b32.xlu0 %v2058_v43, %s2865_s0 }
 0xe1d   : > { %v2060_v26 = vpop.permute.xlu0 %2059 }
 0xe1e   : > { %v2062_v3 = vsel %vm837_vm1, %v2056_v19, %v2060_v26 }
 0xe1f   : > { %2595 = vmatmul.mubr.msk.f32.vlgmr.msra.gmra.mrb[0].mxu0 %vm1858_vm4, %v2062_v3 }
 0xef2   : > { %v2147_v8 = vpop.f32.mrb[0].mxu0 }
 0xef3   : > { %v2148_v28 = vadd.f32 %v2371_v27, %v2147_v8  ;;  %v2596_v45 = vpop.f32.mrb[1].mxu0 }
 0xef5   : > { %2152 = vst.msk [vmem:[#allocation3] sm:$0x3] %vm2151_vm9, %v2148_v28 }
 0xef6 PF: > { %p2693_p6 = scmp.eq.s32.totalorder %s2968_s28, 1  ;;  %s2866_s17 = smov [#allocation3]  }
 0xef7   : > { %s2160_s18 = sshll.u32 %s2866_s17, 4  ;;  %s2161_s18 = int_to_ptr.vmem [resolvable:$true] %s2160_s18 }
 0xef8   : > { %s2818_s1 = scalar_lea.vmem %s2161_s18, 32  ;;  %p2825_p10 = scmp.lt.s32.totalorder %s2161_s18, %s2161_s18 }
 0xef9   : > { %p2819_p7 = scmp.ne.s32.totalorder %s2161_s18, %s2818_s1  ;;  %p2826_p11 = scmp.lt.s32.totalorder %s2818_s1, %s2818_s1 }
 0xefb   : > { %p2820_p8 = pnand %p2819_p7, %p2693_p6  ;;  %p2827_p12 = por %p2826_p11, %p2825_p10 }
 0xefd   : > { %p2821_p9 = pneg %p2820_p8 }
 0xeff   : > { %p2828_p13 = pnand %p2827_p12, %p2821_p9 }
 0xf01   : > { %2831 = shalt.err (!%p2828_p13)
}
 0xf02   : > { %s3418_s2 = sld [smem:[#allocation15_spill]] }
 0xf08   : > { %s2832_s6 = scalar_lea.hbm %s3418_s2, 32 }
 0xf09   : > { %p2833_p0 = scmp.ne.s32.totalorder %s3418_s2, %s2832_s6  ;;  %p2838_p3 = scmp.lt.u32.totalorder %s2832_s6, %s3418_s2 }
 0xf0b   : > { %p2834_p1 = pnand %p2833_p0, %p2693_p6 }
 0xf0d   : > { %p2835_p2 = pneg %p2834_p1 }
 0xf0f   : > { %p2840_p4 = pnand %p2838_p3, %p2835_p2 }
 0xf11   : > { %2843 = shalt.err (!%p2840_p4)
}
 0xf12   : > { %2690 = dma.vmem_to_hbm [thread:$0]  (%p2693_p6), %s2161_s18, 32, %s3418_s2, [#allocation4]  }
 0xf13   : > { %2849 = dma.done.wait (%p2693_p6), [#allocation4], 32  }
 0xf14   : > { %2851 = vsyncadd (%p2693_p6), [#allocation4], 4294967264 }
 0xf15 PF: > { %s3419_s29 = sld [smem:[#allocation6_spill]] }
 0xf1b   : > { %s29_s27 = sadd.s32 1, %s3419_s29  }
 0xf1c   : > { %p26_p5 = scmp.ge.s32.totalorder %s29_s27, 4  }
 0xf1e   :  { %28 = sbr.rel (!%p26_p5) target bundleno = 10 (0xa), region = 160 }
 0xf25   :  { %2173 = vsyncpa [#allocation4], 1 }
 0xf26   :  { %2175 = vsyncpa [#allocation4 + $0x1], 1 }

</bundles_post_ra>
